<compile_context>
chip_gen: v6e
topology: v6e:2x2x1
jax: 0.10.0
libtpu: 0.0.40
codegen_flags: <defaults>
</compile_context>

<pallas_src>
import functools

import jax
import jax.numpy as jnp
from jax.experimental import pallas as pl
from jax.experimental.pallas import tpu as pltpu

LANE = 128


def _round_up(n, m):
    return ((n + m - 1) // m) * m


def _choose_tm(batch, tm_max=1024, min_steps=8):
    """Batch tile: big enough to amortize the ~0.35us per-step overhead, small
    enough to keep >= min_steps grid steps (v7x megacore + DMA/compute overlap),
    capped at 1024 so v5e's 16 MiB default scoped VMEM is never an issue."""
    tm = _round_up(pl.cdiv(batch, min_steps), 128)
    tm = min(tm, tm_max)
    tm = min(tm, _round_up(batch, 8))   # never let one tile exceed the batch
    return max(tm, 8)


def mlp_kernel(x_ref, w1_ref, b1_ref, w2_ref, b2_ref, w3_ref, b3_ref, out_ref,
               *, num_valid_out):
    # x tile: (TM, 784) f32 straight from HBM; cast to bf16 on the VPU (plenty
    # of slack here) instead of a separate wrapper-side pad+cast pass.
    x = x_ref[...].astype(jnp.bfloat16)

    # fc1 + ReLU  (bf16 operands, f32 accumulate, f32 elementwise)
    h1 = jnp.dot(x, w1_ref[...], preferred_element_type=jnp.float32) + b1_ref[...]
    h1 = jnp.maximum(h1, 0.0)

    # dropout (eval mode) -> identity

    # fc2 + ReLU
    h2 = jnp.dot(h1.astype(jnp.bfloat16), w2_ref[...],
                 preferred_element_type=jnp.float32) + b2_ref[...]
    h2 = jnp.maximum(h2, 0.0)

    # dropout (eval mode) -> identity

    # fc3 (lane-dense 128-wide padded output)
    logits = jnp.dot(h2.astype(jnp.bfloat16), w3_ref[...],
                     preferred_element_type=jnp.float32) + b3_ref[...]

    # mask padded logit columns to -inf so they don't corrupt the normalizer
    col = jax.lax.broadcasted_iota(jnp.int32, logits.shape, 1)
    logits = jnp.where(col < num_valid_out, logits, -jnp.inf)

    # numerically-stable log_softmax over the last axis (f32 math)
    m = jnp.max(logits, axis=-1, keepdims=True)
    shifted = logits - m
    lse = jnp.log(jnp.sum(jnp.exp(shifted), axis=-1, keepdims=True))
    out_ref[...] = (shifted - lse).astype(out_ref.dtype)


def mlp_forward(x, padded_params, *, output_size, tm=None,
                out_dtype=jnp.bfloat16):
    """x: (B, input_size) f32. padded_params: lane-padded bf16 weights / f32 biases."""
    w1, b1, w2, b2, w3, b3 = padded_params
    B, in_dim = x.shape
    assert w1.shape[0] == in_dim, "W1 must keep the un-padded input dim as K"
    out_pad = w3.shape[1]

    if tm is None:
        tm = _choose_tm(B)
    tm = max(8, min(_round_up(tm, 8), _round_up(B, 8)))

    # Only pad the batch when it is not a multiple of 8 (<= 7 dead rows).  The
    # grid uses cdiv, so the last tile may be partial -- no TM-multiple padding
    # and (usually) no wrapper-side copy of x at all.
    b_work = _round_up(B, 8)
    x_in = x if b_work == B else jnp.pad(x, ((0, b_work - B), (0, 0)))

    grid = (pl.cdiv(b_work, tm),)

    def resident(shape):
        # Tiny weight/bias lives whole in VMEM, reused across all grid steps.
        return pl.BlockSpec(shape, lambda i: (0, 0))

    kernel = functools.partial(mlp_kernel, num_valid_out=output_size)

    out = pl.pallas_call(
        kernel,
        out_shape=jax.ShapeDtypeStruct((b_work, out_pad), out_dtype),
        grid=grid,
        in_specs=[
            pl.BlockSpec((tm, in_dim), lambda i: (i, 0)),   # last dim == full dim
            resident(w1.shape), resident(b1.shape),
            resident(w2.shape), resident(b2.shape),
            resident(w3.shape), resident(b3.shape),
        ],
        out_specs=pl.BlockSpec((tm, out_pad), lambda i: (i, 0)),
        compiler_params=pltpu.CompilerParams(
            dimension_semantics=("parallel",),
            vmem_limit_bytes=32 * 1024 * 1024),
    )(x_in, w1, b1, w2, b2, w3, b3)

    # Strip batch padding (if any) and the padded logit columns.
    return out[:B, :output_size]


def init_params(key, input_size=28 * 28, output_size=10, layers=(120, 84)):
    """PyTorch-style Linear init: U(-1/sqrt(fan_in), 1/sqrt(fan_in)); unpadded f32."""
    dims = [input_size, layers[0], layers[1], output_size]
    params = []
    for i in range(3):
        key, kw, kb = jax.random.split(key, 3)
        fan_in, fan_out = dims[i], dims[i + 1]
        bound = 1.0 / (fan_in ** 0.5)
        # Stored as (in, out) so the kernel does x @ W (== x @ W_pt.T).
        w = jax.random.uniform(kw, (fan_in, fan_out), jnp.float32, -bound, bound)
        b = jax.random.uniform(kb, (1, fan_out), jnp.float32, -bound, bound)
        params.extend([w, b])
    return tuple(params)


def pad_params_for_kernel(params_f32):
    """Lane-pad hidden/output dims to 128; weights -> bf16, biases stay f32.

    W1 keeps its original 784 rows (x is fed unpadded, so K must match).
    Zero-padded hidden units are harmless: their pre-activation is 0 (zero
    weight cols + zero bias), ReLU(0)=0, and the next layer's padded weight
    rows are zero.  Padded output columns are masked to -inf in the kernel.
    """
    w1, b1, w2, b2, w3, b3 = params_f32
    h1_p = _round_up(w1.shape[1], LANE)
    h2_p = _round_up(w2.shape[1], LANE)
    out_p = _round_up(w3.shape[1], LANE)

    def pad_w(w, rows, cols):
        return jnp.pad(w, ((0, rows - w.shape[0]), (0, cols - w.shape[1])))

    def pad_b(b, cols):
        return jnp.pad(b, ((0, 0), (0, cols - b.shape[1])))

    return (
        pad_w(w1, w1.shape[0], h1_p).astype(jnp.bfloat16), pad_b(b1, h1_p),
        pad_w(w2, h1_p, h2_p).astype(jnp.bfloat16), pad_b(b2, h2_p),
        pad_w(w3, h2_p, out_p).astype(jnp.bfloat16), pad_b(b3, out_p),
    )


if __name__ == "__main__":
    key = jax.random.PRNGKey(0)
    key, kx = jax.random.split(key)

    batch = 200               # 200 = 128 + 72 -> exercises the partial last tile
    input_size = 28 * 28
    output_size = 10

    x = jax.random.normal(kx, (batch, input_size), dtype=jnp.float32)

    params_f32 = init_params(key, input_size=input_size,
                             output_size=output_size, layers=(120, 84))
    kernel_params = pad_params_for_kernel(params_f32)

    out = mlp_forward(x, kernel_params, output_size=output_size)
    jax.block_until_ready(out)

    assert out.shape == (batch, output_size)

    out_f32 = out.astype(jnp.float32)

    # log_softmax rows must sum (in prob space) to ~1 (bf16 output tolerance)
    row_sums = jnp.sum(jnp.exp(out_f32), axis=1)
    assert bool(jnp.all(jnp.abs(row_sums - 1.0) < 2e-2))

    # compare against a plain-JAX f32 reference of the original (unpadded) module
    def reference(xv, p):
        rw1, rb1, rw2, rb2, rw3, rb3 = p
        h1 = jnp.maximum(xv @ rw1 + rb1, 0.0)
        h2 = jnp.maximum(h1 @ rw2 + rb2, 0.0)
        return jax.nn.log_softmax(h2 @ rw3 + rb3, axis=1)

    ref = reference(x, params_f32)
    assert bool(jnp.all(jnp.abs(out_f32 - ref) < 5e-2))  # bf16 matmul + bf16 output

    print("KERNEL_OK")
</pallas_src>

<mosaic_0001>
module attributes {stable_mosaic.version = 11 : i64} {
  func.func @mlp_kernel(%arg0: i32, %arg1: memref<128x784xf32, #tpu.memory_space<vmem>>, %arg2: memref<784x128xbf16, #tpu.memory_space<vmem>>, %arg3: memref<1x128xf32, #tpu.memory_space<vmem>>, %arg4: memref<128x128xbf16, #tpu.memory_space<vmem>>, %arg5: memref<1x128xf32, #tpu.memory_space<vmem>>, %arg6: memref<128x128xbf16, #tpu.memory_space<vmem>>, %arg7: memref<1x128xf32, #tpu.memory_space<vmem>>, %arg8: memref<128x128xbf16, #tpu.memory_space<vmem>>) attributes {dimension_semantics = [#tpu.dimension_semantics<parallel>], iteration_bounds = array<i64: 2>, scalar_prefetch = 0 : i64, scratch_operands = 0 : i64, tpu.core_type = #tpu.core_type<tc>, window_params = [{transform_indices = @transform_0, window_bounds = array<i64: 128, 784>}, {pipeline_mode = #tpu.pipeline_mode<synchronous>, transform_indices = @transform_1, window_bounds = array<i64: 784, 128>}, {pipeline_mode = #tpu.pipeline_mode<synchronous>, transform_indices = @transform_2, window_bounds = array<i64: 1, 128>}, {pipeline_mode = #tpu.pipeline_mode<synchronous>, transform_indices = @transform_3, window_bounds = array<i64: 128, 128>}, {pipeline_mode = #tpu.pipeline_mode<synchronous>, transform_indices = @transform_4, window_bounds = array<i64: 1, 128>}, {pipeline_mode = #tpu.pipeline_mode<synchronous>, transform_indices = @transform_5, window_bounds = array<i64: 128, 128>}, {pipeline_mode = #tpu.pipeline_mode<synchronous>, transform_indices = @transform_6, window_bounds = array<i64: 1, 128>}, {transform_indices = @transform_7, window_bounds = array<i64: 128, 128>}]} {
    %c0 = arith.constant 0 : index
    %c0_0 = arith.constant 0 : index
    %0 = vector.load %arg1[%c0, %c0_0] : memref<128x784xf32, #tpu.memory_space<vmem>>, vector<128x784xf32>
    %1 = arith.truncf %0 : vector<128x784xf32> to vector<128x784xbf16>
    %c0_1 = arith.constant 0 : index
    %c0_2 = arith.constant 0 : index
    %2 = vector.load %arg2[%c0_1, %c0_2] : memref<784x128xbf16, #tpu.memory_space<vmem>>, vector<784x128xbf16>
    %cst = arith.constant dense<0.000000e+00> : vector<128x128xf32>
    %3 = tpu.matmul %1, %2, %cst {dimension_numbers = #tpu.dot_dimension_numbers<[1], [0], [0], [1], [0, 0, 1, 1], [], []>} : vector<128x784xbf16>, vector<784x128xbf16>, vector<128x128xf32> -> vector<128x128xf32>
    %c0_3 = arith.constant 0 : index
    %c0_4 = arith.constant 0 : index
    %4 = vector.load %arg3[%c0_3, %c0_4] : memref<1x128xf32, #tpu.memory_space<vmem>>, vector<1x128xf32>
    %5 = vector.broadcast %4 : vector<1x128xf32> to vector<128x128xf32>
    %6 = arith.addf %3, %5 : vector<128x128xf32>
    %cst_5 = arith.constant 0.000000e+00 : f32
    %7 = vector.broadcast %cst_5 : f32 to vector<128x128xf32>
    %8 = arith.maximumf %6, %7 : vector<128x128xf32>
    %9 = arith.truncf %8 : vector<128x128xf32> to vector<128x128xbf16>
    %c0_6 = arith.constant 0 : index
    %c0_7 = arith.constant 0 : index
    %10 = vector.load %arg4[%c0_6, %c0_7] : memref<128x128xbf16, #tpu.memory_space<vmem>>, vector<128x128xbf16>
    %cst_8 = arith.constant dense<0.000000e+00> : vector<128x128xf32>
    %11 = tpu.matmul %9, %10, %cst_8 {dimension_numbers = #tpu.dot_dimension_numbers<[1], [0], [0], [1], [0, 0, 1, 1], [], []>} : vector<128x128xbf16>, vector<128x128xbf16>, vector<128x128xf32> -> vector<128x128xf32>
    %c0_9 = arith.constant 0 : index
    %c0_10 = arith.constant 0 : index
    %12 = vector.load %arg5[%c0_9, %c0_10] : memref<1x128xf32, #tpu.memory_space<vmem>>, vector<1x128xf32>
    %13 = vector.broadcast %12 : vector<1x128xf32> to vector<128x128xf32>
    %14 = arith.addf %11, %13 : vector<128x128xf32>
    %cst_11 = arith.constant 0.000000e+00 : f32
    %15 = vector.broadcast %cst_11 : f32 to vector<128x128xf32>
    %16 = arith.maximumf %14, %15 : vector<128x128xf32>
    %17 = arith.truncf %16 : vector<128x128xf32> to vector<128x128xbf16>
    %c0_12 = arith.constant 0 : index
    %c0_13 = arith.constant 0 : index
    %18 = vector.load %arg6[%c0_12, %c0_13] : memref<128x128xbf16, #tpu.memory_space<vmem>>, vector<128x128xbf16>
    %cst_14 = arith.constant dense<0.000000e+00> : vector<128x128xf32>
    %19 = tpu.matmul %17, %18, %cst_14 {dimension_numbers = #tpu.dot_dimension_numbers<[1], [0], [0], [1], [0, 0, 1, 1], [], []>} : vector<128x128xbf16>, vector<128x128xbf16>, vector<128x128xf32> -> vector<128x128xf32>
    %c0_15 = arith.constant 0 : index
    %c0_16 = arith.constant 0 : index
    %20 = vector.load %arg7[%c0_15, %c0_16] : memref<1x128xf32, #tpu.memory_space<vmem>>, vector<1x128xf32>
    %21 = vector.broadcast %20 : vector<1x128xf32> to vector<128x128xf32>
    %22 = arith.addf %19, %21 : vector<128x128xf32>
    %23 = tpu.iota {dimensions = array<i32: 1>} : vector<128x128xi32>
    %c10_i32 = arith.constant 10 : i32
    %24 = vector.broadcast %c10_i32 : i32 to vector<128x128xi32>
    %25 = arith.cmpi slt, %23, %24 : vector<128x128xi32>
    %cst_17 = arith.constant 0xFF800000 : f32
    %26 = vector.broadcast %cst_17 : f32 to vector<128x128xf32>
    %27 = arith.select %25, %22, %26 : vector<128x128xi1>, vector<128x128xf32>
    %cst_18 = arith.constant dense<0xFF800000> : vector<128xf32>
    %28 = vector.multi_reduction <maximumf>, %27, %cst_18 [1] : vector<128x128xf32> to vector<128xf32>
    %29 = vector.shape_cast %28 : vector<128xf32> to vector<128x1xf32>
    %30 = vector.broadcast %29 : vector<128x1xf32> to vector<128x128xf32>
    %31 = arith.subf %27, %30 : vector<128x128xf32>
    %32 = math.exp %31 : vector<128x128xf32>
    %cst_19 = arith.constant dense<0.000000e+00> : vector<128xf32>
    %33 = vector.multi_reduction <add>, %32, %cst_19 [1] : vector<128x128xf32> to vector<128xf32>
    %34 = vector.shape_cast %33 : vector<128xf32> to vector<128x1xf32>
    %35 = math.log %34 : vector<128x1xf32>
    %36 = vector.broadcast %35 : vector<128x1xf32> to vector<128x128xf32>
    %37 = arith.subf %31, %36 : vector<128x128xf32>
    %38 = arith.truncf %37 : vector<128x128xf32> to vector<128x128xbf16>
    %c0_20 = arith.constant 0 : index
    %c0_21 = arith.constant 0 : index
    %39 = vector.load %arg8[%c0_20, %c0_21] : memref<128x128xbf16, #tpu.memory_space<vmem>>, vector<128x128xbf16>
    tpu.vector_store %arg8[%c0_20, %c0_21], %38 {strides = array<i32>} : memref<128x128xbf16, #tpu.memory_space<vmem>>, vector<128x128xbf16>,
    return
  }
  func.func @transform_0(%arg0: i32) -> (i32, i32) {
    %c0_i32 = arith.constant 0 : i32
    %c0_i32_0 = arith.constant 0 : i32
    return %arg0, %c0_i32 : i32, i32
  }
  func.func @transform_1(%arg0: i32) -> (i32, i32) {
    %c0_i32 = arith.constant 0 : i32
    %c0_i32_0 = arith.constant 0 : i32
    %c0_i32_1 = arith.constant 0 : i32
    return %c0_i32, %c0_i32_0 : i32, i32
  }
  func.func @transform_2(%arg0: i32) -> (i32, i32) {
    %c0_i32 = arith.constant 0 : i32
    %c0_i32_0 = arith.constant 0 : i32
    %c0_i32_1 = arith.constant 0 : i32
    return %c0_i32, %c0_i32_0 : i32, i32
  }
  func.func @transform_3(%arg0: i32) -> (i32, i32) {
    %c0_i32 = arith.constant 0 : i32
    %c0_i32_0 = arith.constant 0 : i32
    %c0_i32_1 = arith.constant 0 : i32
    return %c0_i32, %c0_i32_0 : i32, i32
  }
  func.func @transform_4(%arg0: i32) -> (i32, i32) {
    %c0_i32 = arith.constant 0 : i32
    %c0_i32_0 = arith.constant 0 : i32
    %c0_i32_1 = arith.constant 0 : i32
    return %c0_i32, %c0_i32_0 : i32, i32
  }
  func.func @transform_5(%arg0: i32) -> (i32, i32) {
    %c0_i32 = arith.constant 0 : i32
    %c0_i32_0 = arith.constant 0 : i32
    %c0_i32_1 = arith.constant 0 : i32
    return %c0_i32, %c0_i32_0 : i32, i32
  }
  func.func @transform_6(%arg0: i32) -> (i32, i32) {
    %c0_i32 = arith.constant 0 : i32
    %c0_i32_0 = arith.constant 0 : i32
    %c0_i32_1 = arith.constant 0 : i32
    return %c0_i32, %c0_i32_0 : i32, i32
  }
  func.func @transform_7(%arg0: i32) -> (i32, i32) {
    %c0_i32 = arith.constant 0 : i32
    %c0_i32_0 = arith.constant 0 : i32
    return %arg0, %c0_i32 : i32, i32
  }
}

</mosaic_0001>

<bundles_post_ra>
// kernel: tpu_custom_call.1
= control target key start
LH: loop header
LB: loop body
LE: loop exit
PB: predicated region body
PF: predicated region fallthrough
CT: control target
= control target key end

     0   :  { %s3715_s0 = inlined_call_operand.hbm [shape: f32[200,784], index: 0, kind: input, shape index: {}]   ;;  %s3716_s1 = inlined_call_operand.hbm [shape: bf16[784,128], index: 1, kind: input, shape index: {}]   ;;  %s3717_s2 = inlined_call_operand.vmem [shape: f32[1,128], index: 2, kind: input, shape index: {}]   ;;  %s3718_s3 = inlined_call_operand.hbm [shape: bf16[128,128], index: 3, kind: input, shape index: {}]   ;;  %s3719_s4 = inlined_call_operand.vmem [shape: f32[1,128], index: 4, kind: input, shape index: {}]   ;;  %s3720_s5 = inlined_call_operand.hbm [shape: bf16[128,128], index: 5, kind: input, shape index: {}]   ;;  %s3721_s6 = inlined_call_operand.vmem [shape: f32[1,128], index: 6, kind: input, shape index: {}]   ;;  %s3722_s7 = inlined_call_operand.hbm [shape: bf16[200,128], index: 7, kind: output, shape index: {}]  }
   0x1   :  { %3725 = sst [smem:[#allocation20_spill]] %s3716_s1 }
   0x2   :  { %12 = vsyncpa [#allocation3], 0 }
   0x3   :  { %14 = vsyncpa [#allocation3 + $0x1], 0 }
   0x4   :  { %15 = vsyncpa [#allocation6], 0 }
   0x5   :  { %16 = vsyncpa [#allocation9], 0 }
   0x6   :  { %17 = vsyncpa [#allocation4], 0 }
   0x7   :  { %19 = vsyncpa [#allocation4 + $0x1], 0  ;;  %s3057_s24 = smov 0   ;;  %s3059_s25 = smov 0  }
   0x8   :  { %s3061_s26 = smov 0   ;;  %s3063_s27 = smov 0  }
   0x9 LB: > { %s3078_s28 = sadd.s32 4294967295, %s3004_s27   ;;  %s2106_s29 = sadd.s32 4294967294, %s3004_s27   ;;  %s3004_s27 = sphi %s3063_s27, %s3753_s27   ;;  %s3000_s26 = sphi %s3061_s26, %s3752_s26   ;;  %s2996_s25 = sphi %s3059_s25, %s3751_s25   ;;  %s2992_s24 = sphi %s3057_s24, %s3750_s24  }
   0xa   : > { %s3082_s30 = sadd.s32 1, %s3004_s27   ;;  %s32_s8 = sadd.s32 1, %s3000_s26 }
   0xb   : > { %s29_s9 = ssub.s32 %s3004_s27, %s3082_s30  ;;  %p39_p0 = scmp.ne.s32.totalorder %s3000_s26, %s2996_s25 }
   0xc   : > { %p30_p1 = scmp.eq.s32.totalorder %s29_s9, 0  ;;  %p40_p2 = scmp.eq.s32.totalorder %s3004_s27, 0 }
   0xd   : > { %p45_p3 = scmp.ne.s32.totalorder %s2996_s25, %s2992_s24  ;;  %p3723_p4 = scmp.eq.s32.totalorder %s3078_s28, 0 }
   0xe   : > { %s3094_s10 = scalar_select %p30_p1, %s3000_s26, %s32_s8  }
   0xf   : > { %p3096_p5 = por %p40_p2, %p39_p0  ;;  %p3102_p6 = por %p3723_p4, %p45_p3 }
  0x10   : > { %p195_p7 = scmp.eq.s32.totalorder %s3078_s28, 1  ;;  %p201_p8 = scmp.eq.s32.totalorder %s2106_s29, 1 }
  0x11   : > { %s3727_s12 = scalar_select %p3102_p6, 1, 0 }
  0x12   : > { %p2107_p9 = scmp.ge.s32.totalorder %s3004_s27, 1  ;;  %p208_p10 = scmp.lt.s32.totalorder %s3004_s27, 3 }
  0x13   : > { %p3109_p11 = por %p195_p7, %p39_p0  ;;  %p3113_p12 = por %p201_p8, %p45_p3 }
  0x14   : > { %p3117_p13 = pnand %p2107_p9, %p208_p10  ;;  %s3006_s16 = smov [#allocation5]  }
  0x15   : > { %s3728_s13 = scalar_select %p3109_p11, 1, 0 }
  0x16   : > { %s3729_s14 = scalar_select %p3113_p12, 1, 0 }
  0x17   : > { %p2637_p1 = pneg %p3117_p13  ;;  %s220_s17 = sshll.u32 %s3006_s16, 4  ;;  %s221_s17 = int_to_ptr.vmem [resolvable:$true] %s220_s17 }
  0x18   : > { %s3007_s19 = smov [#allocation7]   ;;  %s2839_s21 = scalar_lea.vmem %s221_s17, 6272 }
  0x19   : > { %p3125_p2 = pnand %p2637_p1, %p3723_p4  ;;  %s236_s20 = sshll.u32 %s3007_s19, 4  ;;  %s237_s20 = int_to_ptr.vmem [resolvable:$true] %s236_s20 }
  0x1a   : > { %p2840_p3 = scmp.ne.s32.totalorder %s221_s17, %s2839_s21  ;;  %p2847_p9 = scmp.lt.s32.totalorder %s221_s17, %s221_s17 }
  0x1b   : > { %p2830_p0 = pneg %p3125_p2  ;;  %p2848_p10 = scmp.lt.s32.totalorder %s2839_s21, %s2839_s21 }
  0x1d   : > { %p2842_p7 = pnand %p2840_p3, %p2830_p0  ;;  %p2849_p12 = por %p2848_p10, %p2847_p9 }
  0x1f   : > { %p2843_p8 = pneg %p2842_p7 }
  0x21   : > { %p2850_p1 = pnand %p2849_p12, %p2843_p8 }
  0x23   : > { %2853 = shalt.err (!%p2850_p1)
}
  0x24   : > { %s3008_s22 = smov 64   ;;  %s3009_s23 = smov 4  }
  0x25   : > { %s3732_s1 = sld [smem:[#allocation20_spill]]  ;;  %s2865_s9 = scalar_lea.vmem %s237_s20, 1024 }
  0x26   : > { %p2866_p4 = scmp.ne.s32.totalorder %s237_s20, %s2865_s9  ;;  %p2873_p11 = scmp.lt.s32.totalorder %s237_s20, %s237_s20 }
  0x27   : > { %p2874_p6 = scmp.lt.s32.totalorder %s2865_s9, %s2865_s9 }
  0x28   : > { %p2868_p3 = pnand %p2866_p4, %p2830_p0 }
  0x29   : > { %p2875_p9 = por %p2874_p6, %p2873_p11 }
  0x2a   : > { %p2869_p7 = pneg %p2868_p3 }
  0x2b   : > { %2640 = dma.hbm_to_vmem [thread:$0]  (!%p3125_p2), %s3732_s1, 6272, %s221_s17, [#allocation6], %s3008_s22, %s3008_s22, %s3009_s23  }
  0x2c   : > { %p2876_p12 = pnand %p2875_p9, %p2869_p7 }
  0x2e   : > { %2879 = shalt.err (!%p2876_p12)
}
  0x2f   : > { %2643 = dma.hbm_to_vmem [thread:$0]  (!%p3125_p2), %s3718_s3, 1024, %s237_s20, [#allocation6], %s3008_s22, %s3008_s22, %s3009_s23  }
  0x30   : > { %s3010_s21 = smov [#allocation8]  }
  0x31   : > { %s252_s17 = sshll.u32 %s3010_s21, 4  ;;  %s253_s17 = int_to_ptr.vmem [resolvable:$true] %s252_s17 }
  0x32   : > { %s2891_s29 = scalar_lea.vmem %s253_s17, 1024  ;;  %p2899_p1 = scmp.lt.s32.totalorder %s253_s17, %s253_s17 }
  0x33   : > { %p2892_p8 = scmp.ne.s32.totalorder %s253_s17, %s2891_s29  ;;  %p2900_p6 = scmp.lt.s32.totalorder %s2891_s29, %s2891_s29 }
  0x35   : > { %p2894_p4 = pnand %p2892_p8, %p2830_p0  ;;  %p2901_p11 = por %p2900_p6, %p2899_p1 }
  0x37   : > { %p2895_p10 = pneg %p2894_p4 }
  0x39   : > { %p2902_p3 = pnand %p2901_p11, %p2895_p10 }
  0x3b   : > { %2905 = shalt.err (!%p2902_p3)
}
  0x3c   : > { %2646 = dma.hbm_to_vmem [thread:$0]  (!%p3125_p2), %s3720_s5, 1024, %s253_s17, [#allocation9], %s3008_s22, %s3008_s22, %s3009_s23  }
  0x3d   : > { %p2111_p7 = scmp.ge.s32.totalorder %s3004_s27, 2 }
  0x3f   : > { %265 = sbr.rel (%p2111_p7) target bundleno = 102 (0x66), region = 40 }
  0x44   : > { %268 = sbr.rel (!%p3096_p5) target bundleno = 102 (0x66), region = 44  ;;  %s269_s20 = sand.u32 (%p3096_p5), 1, %s3000_s26  }
  0x45   : > { %s2112_s16 = sshll.u32 (%p3096_p5), %s3004_s27, 4  ;;  %s2620_s19 = smul.u32 (%p3096_p5), 896, %s269_s20 }
  0x46   : > { %s275_s21 = ssub.s32 (%p3096_p5), 25, %s2112_s16  ;;  %s3165_s23 = scalar_lea.sflag (%p3096_p5), [#allocation3], %s269_s20 }
  0x47   : > { %p276_p0 = scmp.lt.s32.totalorder (%p3096_p5), %s275_s21, 16  ;;  %s273_s17 = scalar_lea.vmem (%p3096_p5), [#allocation2], %s2620_s19 }
  0x49   : > { %s3755_s21 = smov (!%p276_p0, %s275_s21), 16 }
  0x4a   : > { %s3162_s18 = smul.u32 896, %s3755_s21 }
  0x4c   : > { %s281_s22 = ssub.s32 14336, %s3162_s18 }
  0x4d   : > { %282 = vsyncadd %s3165_s23, %s281_s22  ;;  %p2115_p5 = scmp.ne.s32.totalorder %s3162_s18, 0  ;;  %s2621_s11 = smul.u32 14336, %s3004_s27 }
  0x4e   : > { %s288_s29 = sshll.u32 %s273_s17, 4  ;;  %s2910_s22 = scalar_lea.hbm %s3715_s0, 22400  ;;  %s3175_s29 = int_to_ptr.vmem [resolvable:$true] %s288_s29 }
  0x4f   : > { %s3173_s16 = scalar_lea.hbm %s3715_s0, %s2621_s11 }
  0x50   : > { %s2906_s20 = scalar_lea.hbm %s3173_s16, %s3162_s18  ;;  %p2911_p8 = scmp.lt.s32.totalorder %s3173_s16, %s3715_s0 }
  0x51   : > { %p2907_p2 = scmp.ne.s32.totalorder %s3173_s16, %s2906_s20  ;;  %p2912_p4 = scmp.lt.s32.totalorder %s2910_s22, %s2906_s20 }
  0x53   : > { %p2908_p9 = pnand %p2907_p2, %p2115_p5  ;;  %p2913_p10 = por %p2912_p4, %p2911_p8 }
  0x55   : > { %p2909_p12 = pneg %p2908_p9 }
  0x57   : > { %p2914_p1 = pnand %p2913_p10, %p2909_p12 }
  0x59   : > { %2917 = shalt.err (!%p2914_p1)
}
  0x5a   : > { %s2918_s11 = scalar_lea.vmem %s3175_s29, %s3162_s18  ;;  %s3011_s8 = smov [#allocation2]  }
  0x5b   : > { %p2919_p6 = scmp.ne.s32.totalorder %s3175_s29, %s2918_s11  ;;  %s2922_s9 = sshll.u32 %s3011_s8, 4  ;;  %s2923_s9 = int_to_ptr.vmem [resolvable:$false] %s2922_s9 }
  0x5c   : > { %s2924_s19 = scalar_lea.vmem %s2923_s9, 28672  ;;  %p2925_p0 = scmp.lt.s32.totalorder %s3175_s29, %s2923_s9 }
  0x5d   : > { %p2920_p11 = pnand %p2919_p6, %p2115_p5  ;;  %p2926_p2 = scmp.lt.s32.totalorder %s2924_s19, %s2918_s11 }
  0x5f   : > { %p2921_p3 = pneg %p2920_p11  ;;  %p2927_p9 = por %p2926_p2, %p2925_p0 }
  0x61   : > { %p2928_p8 = pnand %p2927_p9, %p2921_p3 }
  0x63   : > { %2931 = shalt.err (!%p2928_p8)
}
  0x64   : > { %s3012_s1 = smov 896   ;;  %s3013_s20 = smov 56  }
  0x65   : > { %294 = dma.hbm_to_vmem [thread:$0]  (%p2115_p5), %s3173_s16, %s3162_s18, %s3175_s29, %s3165_s23, %s3012_s1, %s3012_s1, %s3013_s20  }
  0x66 PF: > { %300 = sbr.rel (%p3117_p13) target bundleno = 1227 (0x4cb), region = 48 }
  0x6b   : > { %s3204_s21 = sand.u32 1, %s2996_s25   ;;  %p3733_p12 = scmp.ne.s32.totalorder %s3727_s12, 0 }
  0x6c   : > { %s2622_s22 = smul.u32 896, %s3204_s21  ;;  %s303_s17 = scalar_lea.sflag [#allocation3], %s3204_s21 }
  0x6e   : > { %s3208_s11 = scalar_lea.vmem [#allocation2], %s2622_s22 }
  0x6f   : > { %2975 = dma.done.wait (%p3733_p12), %s303_s17, 14336  }
  0x70   : > { %2977 = vsyncadd (%p3733_p12), %s303_s17, 4294952960  ;;  %p3734_p5 = scmp.eq.s32.totalorder %s3078_s28, 0 }
  0x72   : > { %2979 = dma.done.wait (%p3734_p5), [#allocation6], 7296   ;;  %p3735_p13 = pmov %p3734_p5 }
  0x73   : > { %p3736_p4 = pmov %p3734_p5 }
  0x74   : > { %2981 = vsyncadd (%p3735_p13), [#allocation6], 4294960000 }
  0x75   : > { %2983 = dma.done.wait (%p3736_p4), [#allocation9], 1024   ;;  %p3737_p10 = pmov %p3736_p4 }
  0x76   : > { %v2699_v0 = vld [vmem:[#allocation5 + $0x78] sm:$0xff]   ;;  %v2703_v4 = vld [vmem:[#allocation5 + $0x70] sm:$0xff]   ;;  %v2707_v8 = vld [vmem:[#allocation5 + $0x68] sm:$0xff]   ;;  %vm928_vm0 = vcmask 130048   ;;  %s2123_s8 = sshll.u32 %s3204_s21, 6  ;;  %s1985_s19 = scalar_lea.sflag [#allocation4], %s3204_s21 }
  0x77   : > { %2985 = vsyncadd (%p3737_p10), [#allocation9], 4294966272  ;;  %v2700_v1 = vld [vmem:[#allocation5 + $0xf8] sm:$0xff]   ;;  %2289 = vmatprep.subr.bf16.mxu0 %v2699_v0  ;;  %v2704_v5 = vld [vmem:[#allocation5 + $0xf0] sm:$0xff]   ;;  %s3629_s9 = scalar_lea.vmem [#allocation10], %s2123_s8  ;;  %p3748_p1 = scmp.ne.s32.totalorder %s3728_s13, 0 }
  0x78   : > { %v2701_v2 = vld [vmem:[#allocation5 + $0x38] sm:$0xff]   ;;  %2353 = vmatprep.subr.bf16.mxu1 %v2700_v1  ;;  %v2705_v6 = vld [vmem:[#allocation5 + $0x30] sm:$0xff]   ;;  %v2708_v9 = vld [vmem:[#allocation5 + $0xe8] sm:$0xff]   ;;  %s2217_s1 = sshll.u32 (%p3748_p1), %s3078_s28, 4 }
  0x79   : > { %v2702_v3 = vld [vmem:[#allocation5 + $0xb8] sm:$0xff]   ;;  %2290 = vmatpush3.bf16.msra.mxu0 %v2701_v2  ;;  %v2706_v7 = vld [vmem:[#allocation5 + $0xb0] sm:$0xff]   ;;  %v2709_v10 = vld [vmem:[#allocation5 + $0x28] sm:$0xff]   ;;  %s1993_s20 = ssub.s32 (%p3748_p1), 25, %s2217_s1 }
  0x7a   : > { %2354 = vmatpush3.bf16.msra.mxu1 %v2702_v3  ;;  %2291 = vmatprep.subr.bf16.mxu0 %v2703_v4  ;;  %v2710_v11 = vld [vmem:[#allocation5 + $0xa8] sm:$0xff]   ;;  %v2711_v12 = vld [vmem:[#allocation5 + $0x60] sm:$0xff]   ;;  %v2715_v16 = vld [vmem:[#allocation5 + $0x58] sm:$0xff]   ;;  %p1994_p6 = scmp.lt.s32.totalorder (%p3748_p1), %s1993_s20, 16 }
  0x7b   : > { %2355 = vmatprep.subr.bf16.mxu1 %v2704_v5  ;;  %v2712_v13 = vld [vmem:[#allocation5 + $0xe0] sm:$0xff]   ;;  %v2716_v17 = vld [vmem:[#allocation5 + $0xd8] sm:$0xff]   ;;  %v2719_v20 = vld [vmem:[#allocation5 + $0x50] sm:$0xff]  }
  0x7c   : > { %v2713_v14 = vld [vmem:[#allocation5 + $0x20] sm:$0xff]   ;;  %v2717_v18 = vld [vmem:[#allocation5 + $0x18] sm:$0xff]   ;;  %v2720_v21 = vld [vmem:[#allocation5 + $0xd0] sm:$0xff]  }
  0x7d   : > { %2292 = vmatpush3.bf16.msra.mxu0 %v2705_v6  ;;  %v2714_v15 = vld [vmem:[#allocation5 + $0xa0] sm:$0xff]   ;;  %v2718_v19 = vld [vmem:[#allocation5 + $0x98] sm:$0xff]   ;;  %v2721_v22 = vld [vmem:[#allocation5 + $0x10] sm:$0xff]  }
  0x7e   : > { %2356 = vmatpush3.bf16.msra.mxu1 %v2706_v7  ;;  %2293 = vmatprep.subr.bf16.mxu0 %v2707_v8  ;;  %v2722_v23 = vld [vmem:[#allocation5 + $0x90] sm:$0xff]   ;;  %v2723_v24 = vld [vmem:[#allocation5 + $0x48] sm:$0xff]   ;;  %v2727_v28 = vld [vmem:[#allocation5 + $0x40] sm:$0xff]  }
  0x7f   : > { %2357 = vmatprep.subr.bf16.mxu1 %v2708_v9  ;;  %v2724_v25 = vld [vmem:[#allocation5 + $0xc8] sm:$0xff]   ;;  %v2728_v29 = vld [vmem:[#allocation5 + $0xc0] sm:$0xff]   ;;  %v364_v34 = vld [vmem:[%s3208_s11 + $0x18] sm:$0xff] }
  0x80   : > { %v2725_v26 = vld [vmem:[#allocation5 + $0x8] sm:$0xff]   ;;  %v2729_v30 = vld [vmem:[#allocation5] sm:$0xff]   ;;  %v371_v36 = vld [vmem:[%s3208_s11 + $0x50] sm:$0xff] }
  0x81   : > { %2294 = vmatpush3.bf16.msra.mxu0 %v2709_v10  ;;  %v2726_v27 = vld [vmem:[#allocation5 + $0x88] sm:$0xff]   ;;  %v2730_v31 = vld [vmem:[#allocation5 + $0x80] sm:$0xff]   ;;  %v368_v38 = vld [vmem:[%s3208_s11 + $0x38] sm:$0xff]  ;;  %v476_v39 = vpack.c.bf16 %v371_v36, %v364_v34 }
  0x82   : > { %2358 = vmatpush3.bf16.msra.mxu1 %v2710_v11  ;;  %2295 = vmatprep.subr.bf16.mxu0 %v2711_v12  ;;  %v362_v32 = vld [vmem:[%s3208_s11 + $0x8] sm:$0xff]  ;;  %v369_v33 = vld [vmem:[%s3208_s11 + $0x40] sm:$0xff]  ;;  %v363_v41 = vld [vmem:[%s3208_s11 + $0x10] sm:$0xff] }
  0x83   : > { %2359 = vmatprep.subr.bf16.mxu1 %v2712_v13  ;;  %v474_v35 = vpack.c.bf16 %v369_v33, %v362_v32  ;;  %v361_v37 = vld [vmem:[%s3208_s11] sm:$0xff]  ;;  %v370_v42 = vld [vmem:[%s3208_s11 + $0x48] sm:$0xff]  ;;  %v2731_v44 = vld [vmem:[#allocation5 + $0x178] sm:$0xff]   ;;  %1082 = vmatprep.mubr.bf16.mxu1 %v476_v39 }
  0x84   : > { %v473_v40 = vpack.c.bf16 %v368_v38, %v361_v37  ;;  %v475_v43 = vpack.c.bf16 %v370_v42, %v363_v41  ;;  %v2732_v45 = vld [vmem:[#allocation5 + $0x138] sm:$0xff]   ;;  %v383_v47 = vld [vmem:[%s3208_s11 + $0xb0] sm:$0xff]  ;;  %v378_v48 = vld [vmem:[%s3208_s11 + $0x88] sm:$0xff] }
  0x85   : > { %2296 = vmatpush3.bf16.msra.mxu0 %v2713_v14  ;;  %985 = vmatprep.mubr.bf16.mxu0 %v474_v35  ;;  %v376_v46 = vld [vmem:[%s3208_s11 + $0x78] sm:$0xff]  ;;  %v385_v49 = vld [vmem:[%s3208_s11 + $0xc0] sm:$0xff]  ;;  %v375_v52 = vld [vmem:[%s3208_s11 + $0x70] sm:$0xff] }
  0x86   : > { %2360 = vmatpush3.bf16.msra.mxu1 %v2714_v15  ;;  %2297 = vmatprep.subr.bf16.mxu0 %v2715_v16  ;;  %v481_v50 = vpack.c.bf16 %v383_v47, %v376_v46  ;;  %v483_v51 = vpack.c.bf16 %v385_v49, %v378_v48  ;;  %v382_v53 = vld [vmem:[%s3208_s11 + $0xa8] sm:$0xff]  ;;  %v377_v54 = vld [vmem:[%s3208_s11 + $0x80] sm:$0xff]  ;;  %v384_v55 = vld [vmem:[%s3208_s11 + $0xb8] sm:$0xff] }
  0x87   : > { %2361 = vmatprep.subr.bf16.mxu1 %v2716_v17  ;;  %v480_v56 = vpack.c.bf16 %v382_v53, %v375_v52  ;;  %v2733_v57 = vld [vmem:[#allocation5 + $0x170] sm:$0xff]   ;;  %v482_v58 = vpack.c.bf16 %v384_v55, %v377_v54  ;;  %v390_v60 = vld [vmem:[%s3208_s11 + $0xe8] sm:$0xff]  ;;  %v397_v61 = vld [vmem:[%s3208_s11 + $0x120] sm:$0xff] }
  0x88   : > { %v2734_v59 = vld [vmem:[#allocation5 + $0x130] sm:$0xff]   ;;  %v488_v62 = vpack.c.bf16 %v397_v61, %v390_v60  ;;  %v392_v63 = vld [vmem:[%s3208_s11 + $0xf8] sm:$0xff]  ;;  %v389_v2 = vld [vmem:[%s3208_s11 + $0xe0] sm:$0xff] }
  0x89   : > { %2298 = vmatpush3.bf16.msra.mxu0 %v2717_v18  ;;  %v399_v0 = vld [vmem:[%s3208_s11 + $0x130] sm:$0xff]  ;;  %v396_v3 = vld [vmem:[%s3208_s11 + $0x118] sm:$0xff]  ;;  %v2735_v5 = vld [vmem:[#allocation5 + $0x168] sm:$0xff]  }
  0x8a   : > { %2362 = vmatpush3.bf16.msra.mxu1 %v2718_v19  ;;  %2299 = vmatprep.subr.bf16.mxu0 %v2719_v20  ;;  %v490_v1 = vpack.c.bf16 %v399_v0, %v392_v63  ;;  %v391_v4 = vld [vmem:[%s3208_s11 + $0xf0] sm:$0xff]  ;;  %v2736_v6 = vld [vmem:[#allocation5 + $0x128] sm:$0xff]   ;;  %v404_v8 = vld [vmem:[%s3208_s11 + $0x158] sm:$0xff]  ;;  %v487_v12 = vpack.c.bf16 %v396_v3, %v389_v2 }
  0x8b   : > { %2363 = vmatprep.subr.bf16.mxu1 %v2720_v21  ;;  %v398_v7 = vld [vmem:[%s3208_s11 + $0x128] sm:$0xff]  ;;  %v411_v9 = vld [vmem:[%s3208_s11 + $0x190] sm:$0xff]  ;;  %v413_v11 = vld [vmem:[%s3208_s11 + $0x1a0] sm:$0xff] }
  0x8c   : > { %v406_v10 = vld [vmem:[%s3208_s11 + $0x168] sm:$0xff]  ;;  %v489_v13 = vpack.c.bf16 %v398_v7, %v391_v4  ;;  %v495_v14 = vpack.c.bf16 %v411_v9, %v404_v8  ;;  %v2737_v15 = vld [vmem:[#allocation5 + $0x160] sm:$0xff]   ;;  %v403_v18 = vld [vmem:[%s3208_s11 + $0x150] sm:$0xff] }
  0x8d   : > { %2300 = vmatpush3.bf16.msra.mxu0 %v2721_v22  ;;  %v497_v16 = vpack.c.bf16 %v413_v11, %v406_v10  ;;  %v2738_v17 = vld [vmem:[#allocation5 + $0x120] sm:$0xff]   ;;  %v410_v19 = vld [vmem:[%s3208_s11 + $0x188] sm:$0xff]  ;;  %v412_v21 = vld [vmem:[%s3208_s11 + $0x198] sm:$0xff] }
  0x8e   : > { %2364 = vmatpush3.bf16.msra.mxu1 %v2722_v23  ;;  %2301 = vmatprep.subr.bf16.mxu0 %v2723_v24  ;;  %v405_v20 = vld [vmem:[%s3208_s11 + $0x160] sm:$0xff]  ;;  %v418_v22 = vld [vmem:[%s3208_s11 + $0x1c8] sm:$0xff]  ;;  %v2739_v24 = vld [vmem:[#allocation5 + $0x158] sm:$0xff]  }
  0x8f   : > { %2365 = vmatprep.subr.bf16.mxu1 %v2724_v25  ;;  %v425_v23 = vld [vmem:[%s3208_s11 + $0x200] sm:$0xff]  ;;  %v420_v25 = vld [vmem:[%s3208_s11 + $0x1d8] sm:$0xff]  ;;  %v2741_v32 = vld [vmem:[#allocation5 + $0x150] sm:$0xff]  }
  0x90   : > { %v2742_v33 = vld [vmem:[#allocation5 + $0x110] sm:$0xff]   ;;  %v417_v34 = vld [vmem:[%s3208_s11 + $0x1c0] sm:$0xff]  ;;  %v424_v35 = vld [vmem:[%s3208_s11 + $0x1f8] sm:$0xff] }
  0x91   : > { %2302 = vmatpush3.bf16.msra.mxu0 %v2725_v26  ;;  %v427_v26 = vld [vmem:[%s3208_s11 + $0x210] sm:$0xff]  ;;  %v426_v37 = vld [vmem:[%s3208_s11 + $0x208] sm:$0xff]  ;;  %v432_v38 = vld [vmem:[%s3208_s11 + $0x238] sm:$0xff] }
  0x92   : > { %2366 = vmatpush3.bf16.msra.mxu1 %v2726_v27  ;;  %2303 = vmatprep.subr.bf16.mxu0 %v2727_v28  ;;  %v2740_v27 = vld [vmem:[#allocation5 + $0x118] sm:$0xff]   ;;  %v494_v28 = vpack.c.bf16 %v410_v19, %v403_v18  ;;  %v419_v36 = vld [vmem:[%s3208_s11 + $0x1d0] sm:$0xff]  ;;  %v441_v41 = vld [vmem:[%s3208_s11 + $0x280] sm:$0xff] }
  0x93   : > { %2367 = vmatprep.subr.bf16.mxu1 %v2728_v29  ;;  %v496_v29 = vpack.c.bf16 %v412_v21, %v405_v20  ;;  %v439_v39 = vld [vmem:[%s3208_s11 + $0x270] sm:$0xff]  ;;  %v2743_v42 = vld [vmem:[#allocation5 + $0x148] sm:$0xff]   ;;  %v2745_v49 = vld [vmem:[#allocation5 + $0x140] sm:$0xff]  }
  0x94   : > { %v509_v46 = vpack.c.bf16 %v439_v39, %v432_v38  ;;  %v431_v48 = vld [vmem:[%s3208_s11 + $0x230] sm:$0xff]  ;;  %v2746_v52 = vld [vmem:[#allocation5 + $0x100] sm:$0xff]   ;;  %v440_v53 = vld [vmem:[%s3208_s11 + $0x278] sm:$0xff] }
  0x95   : > { %2304 = vmatpush3.bf16.msra.mxu0 %v2729_v30  ;;  %v502_v30 = vpack.c.bf16 %v425_v23, %v418_v22  ;;  %v446_v54 = vld [vmem:[%s3208_s11 + $0x2a8] sm:$0xff]  ;;  %v453_v55 = vld [vmem:[%s3208_s11 + $0x2e0] sm:$0xff]  ;;  %v452_v0 = vld [vmem:[%s3208_s11 + $0x2d8] sm:$0xff] }
  0x96   : > { %2368 = vmatpush3.bf16.msra.mxu1 %v2730_v31  ;;  %2417 = vmatprep.subr.bf16.mxu0 %v2731_v44  ;;  %v504_v31 = vpack.c.bf16 %v427_v26, %v420_v25  ;;  %v516_v60 = vpack.c.bf16 %v453_v55, %v446_v54  ;;  %v445_v63 = vld [vmem:[%s3208_s11 + $0x2a0] sm:$0xff]  ;;  %v454_v2 = vld [vmem:[%s3208_s11 + $0x2e8] sm:$0xff]  ;;  %v460_v3 = vld [vmem:[%s3208_s11 + $0x318] sm:$0xff] }
  0x97   : > { %2604 = vmatprep.subr.bf16.mxu1 %v2731_v44  ;;  %v2744_v44 = vld [vmem:[#allocation5 + $0x108] sm:$0xff]   ;;  %v467_v4 = vld [vmem:[%s3208_s11 + $0x350] sm:$0xff]  ;;  %v515_v7 = vpack.c.bf16 %v452_v0, %v445_v63  ;;  %v457_v18 = vld [vmem:[%s3208_s11 + $0x300] sm:$0xff] }
  0x98   : > { %986 = vmatmul.mubr.bf16.vlgmr.msra.gmra.mxu0 %v473_v40  ;;  %v434_v40 = vld [vmem:[%s3208_s11 + $0x248] sm:$0xff]  ;;  %v523_v9 = vpack.c.bf16 %v467_v4, %v460_v3  ;;  %v459_v11 = vld [vmem:[%s3208_s11 + $0x310] sm:$0xff]  ;;  %v365_v23 = vld [vmem:[%s3208_s11 + $0x20] sm:$0xff] }
  0x99   : > { %1083 = vmatmul.mubr.bf16.vlgmr.msra.gmra.mxu1 %v475_v43  ;;  %2418 = vmatpush3.bf16.msra.mxu0 %v2732_v45  ;;  %v501_v43 = vpack.c.bf16 %v424_v35, %v417_v34  ;;  %v511_v47 = vpack.c.bf16 %v441_v41, %v434_v40  ;;  %v449_v25 = vld [vmem:[%s3208_s11 + $0x2c0] sm:$0xff]  ;;  %v456_v26 = vld [vmem:[%s3208_s11 + $0x2f8] sm:$0xff]  ;;  %v379_v35 = vld [vmem:[%s3208_s11 + $0x90] sm:$0xff] }
  0x9a   : > { %2612 = vmatpush3.bf16.msra.mxu1 %v2732_v45  ;;  %993 = vmatprep.mubr.bf16.mxu0 %v481_v50  ;;  %v503_v45 = vpack.c.bf16 %v426_v37, %v419_v36  ;;  %v438_v50 = vld [vmem:[%s3208_s11 + $0x268] sm:$0xff]  ;;  %v463_v37 = vld [vmem:[%s3208_s11 + $0x330] sm:$0xff]  ;;  %v401_v40 = vld [vmem:[%s3208_s11 + $0x140] sm:$0xff] }
  0x9b   : > { %1090 = vmatprep.mubr.bf16.mxu1 %v483_v51  ;;  %2419 = vmatprep.subr.bf16.mxu0 %v2733_v57  ;;  %v433_v51 = vld [vmem:[%s3208_s11 + $0x240] sm:$0xff]  ;;  %v386_v36 = vld [vmem:[%s3208_s11 + $0xc8] sm:$0xff]  ;;  %v367_v41 = vld [vmem:[%s3208_s11 + $0x30] sm:$0xff] }
  0x9c   : > { %2605 = vmatprep.subr.bf16.mxu1 %v2733_v57  ;;  %v455_v57 = vld [vmem:[%s3208_s11 + $0x2f0] sm:$0xff]  ;;  %v470_v38 = vld [vmem:[%s3208_s11 + $0x368] sm:$0xff]  ;;  %v429_v0 = vld [vmem:[%s3208_s11 + $0x220] sm:$0xff] }
  0x9d   : > { %2420 = vmatpush3.bf16.msra.mxu0 %v2734_v59  ;;  %v394_v39 = vld [vmem:[%s3208_s11 + $0x108] sm:$0xff] }
  0x9e   : > { %2613 = vmatpush3.bf16.msra.mxu1 %v2734_v59  ;;  %2421 = vmatprep.subr.bf16.mxu0 %v2735_v5  ;;  %v510_v59 = vpack.c.bf16 %v440_v53, %v433_v51  ;;  %v408_v51 = vld [vmem:[%s3208_s11 + $0x178] sm:$0xff]  ;;  %v395_v53 = vld [vmem:[%s3208_s11 + $0x110] sm:$0xff]  ;;  %v402_v54 = vld [vmem:[%s3208_s11 + $0x148] sm:$0xff] }
  0x9f   : > { %2606 = vmatprep.subr.bf16.mxu1 %v2735_v5  ;;  %v462_v5 = vld [vmem:[%s3208_s11 + $0x328] sm:$0xff] }
  0xa0   : > { %994 = vmatmul.mubr.bf16.gmra.mxu0 %v480_v56  ;;  %v448_v56 = vld [vmem:[%s3208_s11 + $0x2b8] sm:$0xff]  ;;  %v422_v63 = vld [vmem:[%s3208_s11 + $0x1e8] sm:$0xff] }
  0xa1   : > { %1091 = vmatmul.mubr.bf16.gmra.mxu1 %v482_v58  ;;  %1001 = vmatprep.mubr.bf16.mxu0 %v488_v62  ;;  %v508_v58 = vpack.c.bf16 %v438_v50, %v431_v48  ;;  %v518_v61 = vpack.c.bf16 %v455_v57, %v448_v56  ;;  %v2747_v62 = vld [vmem:[#allocation5 + $0x180] sm:$0xff]   ;;  %v400_v48 = vld [vmem:[%s3208_s11 + $0x138] sm:$0xff] }
  0xa2   : > { %1098 = vmatprep.mubr.bf16.mxu1 %v490_v1  ;;  %2422 = vmatpush3.bf16.msra.mxu0 %v2736_v6  ;;  %v447_v1 = vld [vmem:[%s3208_s11 + $0x2b0] sm:$0xff]  ;;  %v388_v50 = vld [vmem:[%s3208_s11 + $0xd8] sm:$0xff] }
  0xa3   : > { %2614 = vmatpush3.bf16.msra.mxu1 %v2736_v6  ;;  %2423 = vmatprep.subr.bf16.mxu0 %v2737_v15  ;;  %v469_v6 = vld [vmem:[%s3208_s11 + $0x360] sm:$0xff]  ;;  %v517_v8 = vpack.c.bf16 %v454_v2, %v447_v1  ;;  %v423_v1 = vld [vmem:[%s3208_s11 + $0x1f0] sm:$0xff]  ;;  %v430_v2 = vld [vmem:[%s3208_s11 + $0x228] sm:$0xff] }
  0xa4   : > { %2607 = vmatprep.subr.bf16.mxu1 %v2737_v15  ;;  %v525_v10 = vpack.c.bf16 %v469_v6, %v462_v5  ;;  %v366_v15 = vld [vmem:[%s3208_s11 + $0x28] sm:$0xff]  ;;  %v506_v5 = vpack.c.bf16 %v429_v0, %v422_v63  ;;  %v507_v6 = vpack.c.bf16 %v430_v2, %v423_v1  ;;  %v2760_v63 = vld [vmem:[#allocation8 + $0x18] sm:$0xff]  }
  0xa6   : > { %2424 = vmatpush3.bf16.msra.mxu0 %v2738_v17 }
  0xa7   : > { %2615 = vmatpush3.bf16.msra.mxu1 %v2738_v17  ;;  %2425 = vmatprep.subr.bf16.mxu0 %v2739_v24  ;;  %v450_v17 = vld [vmem:[%s3208_s11 + $0x2c8] sm:$0xff] }
  0xa8   : > { %1002 = vmatmul.mubr.bf16.gmra.mxu0 %v487_v12  ;;  %2608 = vmatprep.subr.bf16.mxu1 %v2739_v24  ;;  %v466_v12 = vld [vmem:[%s3208_s11 + $0x348] sm:$0xff]  ;;  %v520_v22 = vpack.c.bf16 %v457_v18, %v450_v17  ;;  %v372_v24 = vld [vmem:[%s3208_s11 + $0x58] sm:$0xff] }
  0xa9   : > { %1099 = vmatmul.mubr.bf16.gmra.mxu1 %v489_v13  ;;  %1009 = vmatprep.mubr.bf16.mxu0 %v495_v14  ;;  %v461_v13 = vld [vmem:[%s3208_s11 + $0x320] sm:$0xff]  ;;  %v468_v14 = vld [vmem:[%s3208_s11 + $0x358] sm:$0xff]  ;;  %v522_v19 = vpack.c.bf16 %v466_v12, %v459_v11  ;;  %v443_v12 = vld [vmem:[%s3208_s11 + $0x290] sm:$0xff] }
  0xaa   : > { %1106 = vmatprep.mubr.bf16.mxu1 %v497_v16  ;;  %2426 = vmatpush3.bf16.msra.mxu0 %v2740_v27  ;;  %v373_v16 = vld [vmem:[%s3208_s11 + $0x60] sm:$0xff]  ;;  %v524_v20 = vpack.c.bf16 %v468_v14, %v461_v13  ;;  %v436_v11 = vld [vmem:[%s3208_s11 + $0x258] sm:$0xff]  ;;  %v451_v13 = vld [vmem:[%s3208_s11 + $0x2d0] sm:$0xff] }
  0xab   : > { %2616 = vmatpush3.bf16.msra.mxu1 %v2740_v27  ;;  %2427 = vmatprep.subr.bf16.mxu0 %v2741_v32  ;;  %v478_v21 = vpack.c.bf16 %v373_v16, %v366_v15  ;;  %v380_v27 = vld [vmem:[%s3208_s11 + $0x98] sm:$0xff]  ;;  %v458_v14 = vld [vmem:[%s3208_s11 + $0x308] sm:$0xff]  ;;  %v513_v17 = vpack.c.bf16 %v443_v12, %v436_v11 }
  0xac   : > { %2609 = vmatprep.subr.bf16.mxu1 %v2741_v32  ;;  %v519_v32 = vpack.c.bf16 %v456_v26, %v449_v25  ;;  %v521_v18 = vpack.c.bf16 %v458_v14, %v451_v13  ;;  %v2748_v25 = vld [vmem:[#allocation7 + $0x38] sm:$0xff]   ;;  %v2749_v26 = vld [vmem:[#allocation7 + $0x30] sm:$0xff]  }
  0xae   : > { %2428 = vmatpush3.bf16.msra.mxu0 %v2742_v33 }
  0xaf   : > { %2617 = vmatpush3.bf16.msra.mxu1 %v2742_v33  ;;  %2429 = vmatprep.subr.bf16.mxu0 %v2743_v42 }
  0xb0   : > { %1010 = vmatmul.mubr.bf16.gmra.mxu0 %v494_v28  ;;  %2610 = vmatprep.subr.bf16.mxu1 %v2743_v42  ;;  %v387_v28 = vld [vmem:[%s3208_s11 + $0xd0] sm:$0xff]  ;;  %v374_v42 = vld [vmem:[%s3208_s11 + $0x68] sm:$0xff] }
  0xb1   : > { %1107 = vmatmul.mubr.bf16.gmra.mxu1 %v496_v29  ;;  %1017 = vmatprep.mubr.bf16.mxu0 %v502_v30  ;;  %v464_v29 = vld [vmem:[%s3208_s11 + $0x338] sm:$0xff]  ;;  %v471_v30 = vld [vmem:[%s3208_s11 + $0x370] sm:$0xff]  ;;  %v485_v33 = vpack.c.bf16 %v387_v28, %v380_v27  ;;  %v2751_v28 = vld [vmem:[#allocation7 + $0x20] sm:$0xff]  }
  0xb2   : > { %1114 = vmatprep.mubr.bf16.mxu1 %v504_v31  ;;  %2430 = vmatpush3.bf16.msra.mxu0 %v2744_v44  ;;  %v477_v31 = vpack.c.bf16 %v372_v24, %v365_v23  ;;  %v527_v34 = vpack.c.bf16 %v471_v30, %v464_v29  ;;  %v2750_v27 = vld [vmem:[#allocation7 + $0x28] sm:$0xff]   ;;  %v2752_v29 = vld [vmem:[#allocation7 + $0x18] sm:$0xff]   ;;  %v2753_v30 = vld [vmem:[#allocation7 + $0x10] sm:$0xff]  }
  0xb3   : > { %2618 = vmatpush3.bf16.msra.mxu1 %v2744_v44  ;;  %2431 = vmatprep.subr.bf16.mxu0 %v2745_v49  ;;  %v526_v44 = vpack.c.bf16 %v470_v38, %v463_v37  ;;  %v3345_v37 = vld [vmem:[%s3717_s2] ss:$0 sm:$0xff] }
  0xb4   : > { %2611 = vmatprep.subr.bf16.mxu1 %v2745_v49  ;;  %v381_v49 = vld [vmem:[%s3208_s11 + $0xa0] sm:$0xff] }
  0xb5   : > { %v486_v56 = vpack.c.bf16 %v388_v50, %v381_v49 }
  0xb6   : > { %2432 = vmatpush3.bf16.msra.mxu0 %v2746_v52 }
  0xb7   : > { %2619 = vmatpush3.bf16.msra.mxu1 %v2746_v52  ;;  %v415_v52 = vld [vmem:[%s3208_s11 + $0x1b0] sm:$0xff] }
  0xb8   : > { %1018 = vmatmul.mubr.bf16.gmra.mxu0 %v501_v43  ;;  %2522 = vmatprep.subr.bf16.mxu1 %v2747_v62  ;;  %v484_v43 = vpack.c.bf16 %v386_v36, %v379_v35  ;;  %v499_v57 = vpack.c.bf16 %v415_v52, %v408_v51  ;;  %v2756_v35 = vld [vmem:[#allocation8 + $0x38] sm:$0xff]   ;;  %v2757_v36 = vld [vmem:[#allocation8 + $0x30] sm:$0xff]  }
  0xb9   : > { %1115 = vmatmul.mubr.bf16.gmra.mxu1 %v503_v45  ;;  %1025 = vmatprep.mubr.bf16.mxu0 %v509_v46  ;;  %v492_v45 = vpack.c.bf16 %v401_v40, %v394_v39  ;;  %v479_v46 = vpack.c.bf16 %v374_v42, %v367_v41 }
  0xba   : > { %1122 = vmatprep.mubr.bf16.mxu1 %v511_v47  ;;  %v393_v47 = vld [vmem:[%s3208_s11 + $0x100] sm:$0xff]  ;;  %2572 = vmatprep.subr.bf16.mxu0 %v2756_v35 }
  0xbb   : > { %v491_v55 = vpack.c.bf16 %v400_v48, %v393_v47 }
  0xc0   : > { %1026 = vmatmul.mubr.bf16.gmra.mxu0 %v508_v58  ;;  %v493_v58 = vpack.c.bf16 %v402_v54, %v395_v53  ;;  %v2759_v54 = vld [vmem:[#allocation8 + $0x20] sm:$0xff]  }
  0xc1   : > { %1123 = vmatmul.mubr.bf16.gmra.mxu1 %v510_v59  ;;  %1033 = vmatprep.mubr.bf16.mxu0 %v516_v60  ;;  %v407_v59 = vld [vmem:[%s3208_s11 + $0x170] sm:$0xff]  ;;  %v414_v60 = vld [vmem:[%s3208_s11 + $0x1a8] sm:$0xff] }
  0xc2   : > { %1130 = vmatprep.mubr.bf16.mxu1 %v518_v61  ;;  %v409_v61 = vld [vmem:[%s3208_s11 + $0x180] sm:$0xff]  ;;  %v498_v3 = vpack.c.bf16 %v414_v60, %v407_v59 }
  0xc8   : > { %1034 = vmatmul.mubr.bf16.gmra.mxu0 %v515_v7  ;;  %v421_v7 = vld [vmem:[%s3208_s11 + $0x1e0] sm:$0xff] }
  0xc9   : > { %1131 = vmatmul.mubr.bf16.gmra.mxu1 %v517_v8  ;;  %1041 = vmatprep.mubr.bf16.mxu0 %v523_v9  ;;  %v428_v8 = vld [vmem:[%s3208_s11 + $0x218] sm:$0xff]  ;;  %v437_v9 = vld [vmem:[%s3208_s11 + $0x260] sm:$0xff] }
  0xca   : > { %1138 = vmatprep.mubr.bf16.mxu1 %v525_v10  ;;  %v444_v10 = vld [vmem:[%s3208_s11 + $0x298] sm:$0xff]  ;;  %v505_v15 = vpack.c.bf16 %v428_v8, %v421_v7 }
  0xcb   : > { %v514_v16 = vpack.c.bf16 %v444_v10, %v437_v9 }
  0xd0   : > { %1042 = vmatmul.mubr.bf16.gmra.mxu0 %v522_v19  ;;  %v435_v19 = vld [vmem:[%s3208_s11 + $0x250] sm:$0xff] }
  0xd1   : > { %1139 = vmatmul.mubr.bf16.gmra.mxu1 %v524_v20  ;;  %1179 = vmatprep.mubr.bf16.mxu0 %v478_v21  ;;  %v442_v20 = vld [vmem:[%s3208_s11 + $0x288] sm:$0xff]  ;;  %v465_v21 = vld [vmem:[%s3208_s11 + $0x340] sm:$0xff] }
  0xd2   : > { %1227 = vmatprep.mubr.bf16.mxu1 %v520_v22  ;;  %v472_v22 = vld [vmem:[%s3208_s11 + $0x378] sm:$0xff]  ;;  %v512_v23 = vpack.c.bf16 %v442_v20, %v435_v19 }
  0xd3   : > { %v528_v24 = vpack.c.bf16 %v472_v22, %v465_v21 }
  0xd8   : > { %1180 = vmatmul.mubr.bf16.vlgmr.msra.gmra.mxu0 %v477_v31  ;;  %v2754_v31 = vld [vmem:[#allocation7 + $0x8] sm:$0xff]  }
  0xd9   : > { %1228 = vmatmul.mubr.bf16.vlgmr.msra.gmra.mxu1 %v519_v32  ;;  %1187 = vmatprep.mubr.bf16.mxu0 %v485_v33  ;;  %v2755_v32 = vld [vmem:[#allocation7] sm:$0xff]  }
  0xda   : > { %1235 = vmatprep.mubr.bf16.mxu1 %v527_v34  ;;  %2523 = vmatpush3.bf16.msra.mxu1 %v2747_v62  ;;  %v416_v62 = vld [vmem:[%s3208_s11 + $0x1b8] sm:$0xff] }
  0xdb   : > { %v500_v4 = vpack.c.bf16 %v416_v62, %v409_v61  ;;  %2540 = vmatprep.subr.bf16.mxu1 %v2748_v25  ;;  %2573 = vmatpush3.bf16.msra.mxu0 %v2756_v35 }
  0xdc   : > { %2574 = vmatprep.subr.bf16.mxu0 %v2757_v36 }
  0xdf   : > { %2575 = vmatpush3.bf16.msra.mxu0 %v2757_v36 }
  0xe0   : > { %1188 = vmatmul.mubr.bf16.gmra.mxu0 %v484_v43 }
  0xe1   : > { %1236 = vmatmul.mubr.bf16.gmra.mxu1 %v526_v44  ;;  %1195 = vmatprep.mubr.bf16.mxu0 %v492_v45  ;;  %v2758_v45 = vld [vmem:[#allocation8 + $0x28] sm:$0xff]  }
  0xe2   : > { %2524 = vmatprep.mubr.msk.bf16.mxu1 %vm928_vm0, %v479_v46  ;;  %2576 = vmatprep.subr.bf16.mxu0 %v2758_v45 }
  0xe3   : > { %2577 = vmatpush3.bf16.msra.mxu0 %v2758_v45 }
  0xe4   : > { %2578 = vmatprep.subr.bf16.mxu0 %v2759_v54 }
  0xe7   : > { %2579 = vmatpush3.bf16.msra.mxu0 %v2759_v54 }
  0xe8   : > { %1196 = vmatmul.mubr.bf16.gmra.mxu0 %v491_v55  ;;  %2580 = vmatprep.subr.bf16.mxu0 %v2760_v63 }
  0xe9   : > { %2525 = vmatmul.mubr.msk.bf16.vlgmr.msra.gmra.mxu1 %vm928_vm0, %v486_v56  ;;  %1203 = vmatprep.mubr.bf16.mxu0 %v499_v57 }
  0xea   : > { %2528 = vmatprep.mubr.msk.bf16.mxu1 %vm928_vm0, %v493_v58  ;;  %2541 = vmatpush3.bf16.msra.mxu1 %v2748_v25 }
  0xeb   : > { %2542 = vmatprep.subr.bf16.mxu1 %v2749_v26  ;;  %2581 = vmatpush3.bf16.msra.mxu0 %v2760_v63 }
  0xee   : > { %2543 = vmatpush3.bf16.msra.mxu1 %v2749_v26 }
  0xef   : > { %2544 = vmatprep.subr.bf16.mxu1 %v2750_v27 }
  0xf0   : > { %1204 = vmatmul.mubr.bf16.gmra.mxu0 %v498_v3 }
  0xf1   : > { %2529 = vmatmul.mubr.msk.bf16.gmra.mxu1 %vm928_vm0, %v500_v4  ;;  %1211 = vmatprep.mubr.bf16.mxu0 %v506_v5 }
  0xf2   : > { %2532 = vmatprep.mubr.msk.bf16.mxu1 %vm928_vm0, %v507_v6  ;;  %2545 = vmatpush3.bf16.msra.mxu1 %v2750_v27 }
  0xf3   : > { %2546 = vmatprep.subr.bf16.mxu1 %v2751_v28 }
  0xf6   : > { %2547 = vmatpush3.bf16.msra.mxu1 %v2751_v28 }
  0xf7   : > { %2548 = vmatprep.subr.bf16.mxu1 %v2752_v29 }
  0xf8   : > { %1212 = vmatmul.mubr.bf16.gmra.mxu0 %v505_v15 }
  0xf9   : > { %2533 = vmatmul.mubr.msk.bf16.gmra.mxu1 %vm928_vm0, %v514_v16  ;;  %1219 = vmatprep.mubr.bf16.mxu0 %v513_v17 }
  0xfa   : > { %2536 = vmatprep.mubr.msk.bf16.mxu1 %vm928_vm0, %v521_v18  ;;  %2549 = vmatpush3.bf16.msra.mxu1 %v2752_v29 }
  0xfb   : > { %2550 = vmatprep.subr.bf16.mxu1 %v2753_v30 }
  0xfe   : > { %2551 = vmatpush3.bf16.msra.mxu1 %v2753_v30 }
  0xff   : > { %2552 = vmatprep.subr.bf16.mxu1 %v2754_v31 }
 0x100   : > { %1220 = vmatmul.mubr.bf16.gmra.mxu0 %v512_v23 }
 0x101   : > { %2537 = vmatmul.mubr.msk.bf16.gmra.mxu1 %vm928_vm0, %v528_v24 }
 0x102   : > { %2553 = vmatpush3.bf16.msra.mxu1 %v2754_v31 }
 0x103   : > { %2554 = vmatprep.subr.bf16.mxu1 %v2755_v32 }
 0x106   : > { %2555 = vmatpush3.bf16.msra.mxu1 %v2755_v32 }
 0x158   : > { %v2305_v33 = vpop.f32.mrf.mxu0 }
 0x159   : > { %v2369_v34 = vpop.f32.mrf.mxu1 }
 0x15a   : > { %v2306_v38 = vpop.f32.mrf.mxu0 }
 0x15b   : > { %v2307_v39 = vadd.f32 %v2306_v38, %v2305_v33  ;;  %v2370_v40 = vpop.f32.mrf.mxu1 }
 0x15c   : > { %v2371_v41 = vadd.f32 %v2370_v40, %v2369_v34  ;;  %v2308_v42 = vpop.f32.mrf.mxu0 }
 0x15d   : > { %v988_v43 = vadd.f32 %v2307_v39, %v3345_v37  ;;  %v2372_v44 = vpop.f32.mrf.mxu1 }
 0x15e   : > { %v2309_v46 = vpop.f32.mrf.mxu0 }
 0x15f   : > { %v3348_v47 = vadd.f32 %v2371_v41, %v988_v43  ;;  %v2310_v48 = vadd.f32 %v2309_v46, %v2308_v42  ;;  %v2373_v49 = vpop.f32.mrf.mxu1 }
 0x160   : > { %v2374_v50 = vadd.f32 %v2373_v49, %v2372_v44  ;;  %v2311_v51 = vpop.f32.mrf.mxu0 }
 0x161   : > { %v991_v52 = vadd.f32 %v2310_v48, %v3345_v37  ;;  %v2375_v53 = vpop.f32.mrf.mxu1 }
 0x162   : > { %v2312_v55 = vpop.f32.mrf.mxu0 }
 0x163   : > { %v3351_v56 = vadd.f32 %v2374_v50, %v991_v52  ;;  %v2313_v57 = vadd.f32 %v2312_v55, %v2311_v51  ;;  %v2376_v58 = vpop.f32.mrf.mxu1 }
 0x164   : > { %v2377_v59 = vadd.f32 %v2376_v58, %v2375_v53  ;;  %v2314_v60 = vpop.f32.mrf.mxu0 }
 0x165   : > { %v996_v61 = vadd.f32 %v2313_v57, %v3345_v37  ;;  %v2378_v62 = vpop.f32.mrf.mxu1 }
 0x166   : > { %v2315_v0 = vpop.f32.mrf.mxu0 }
 0x167   : > { %v3354_v1 = vadd.f32 %v2377_v59, %v996_v61  ;;  %v2316_v2 = vadd.f32 %v2315_v0, %v2314_v60  ;;  %v2379_v3 = vpop.f32.mrf.mxu1 }
 0x168   : > { %v2380_v4 = vadd.f32 %v2379_v3, %v2378_v62  ;;  %v2317_v5 = vpop.f32.mrf.mxu0 }
 0x169   : > { %v999_v6 = vadd.f32 %v2316_v2, %v3345_v37  ;;  %v2381_v7 = vpop.f32.mrf.mxu1 }
 0x16a   : > { %v2318_v8 = vpop.f32.mrf.mxu0 }
 0x16b   : > { %v3357_v9 = vadd.f32 %v2380_v4, %v999_v6  ;;  %v2319_v10 = vadd.f32 %v2318_v8, %v2317_v5  ;;  %v2382_v11 = vpop.f32.mrf.mxu1 }
 0x16c   : > { %v2383_v12 = vadd.f32 %v2382_v11, %v2381_v7  ;;  %v2320_v13 = vpop.f32.mrf.mxu0 }
 0x16d   : > { %v1004_v14 = vadd.f32 %v2319_v10, %v3345_v37  ;;  %v2384_v15 = vpop.f32.mrf.mxu1 }
 0x16e   : > { %v2321_v16 = vpop.f32.mrf.mxu0 }
 0x16f   : > { %v3360_v17 = vadd.f32 %v2383_v12, %v1004_v14  ;;  %v2322_v18 = vadd.f32 %v2321_v16, %v2320_v13  ;;  %v2385_v19 = vpop.f32.mrf.mxu1 }
 0x170   : > { %v2386_v20 = vadd.f32 %v2385_v19, %v2384_v15  ;;  %v2323_v21 = vpop.f32.mrf.mxu0 }
 0x171   : > { %v1007_v22 = vadd.f32 %v2322_v18, %v3345_v37  ;;  %v2387_v23 = vpop.f32.mrf.mxu1 }
 0x172   : > { %v2324_v24 = vpop.f32.mrf.mxu0 }
 0x173   : > { %v3363_v25 = vadd.f32 %v2386_v20, %v1007_v22  ;;  %v2325_v26 = vadd.f32 %v2324_v24, %v2323_v21  ;;  %v2388_v27 = vpop.f32.mrf.mxu1 }
 0x174   : > { %v2389_v28 = vadd.f32 %v2388_v27, %v2387_v23  ;;  %v3365_v29 = vpop.f32.mrf.mxu0 }
 0x175   : > { %v1012_v30 = vadd.f32 %v2325_v26, %v3345_v37  ;;  %v3368_v31 = vpop.f32.mrf.mxu1 }
 0x176   : > { %v3370_v32 = vpop.f32.mrf.mxu0 }
 0x177   : > { %v3372_v33 = vadd.f32 %v2389_v28, %v1012_v30  ;;  %v3374_v34 = vpop.f32.mrf.mxu1 }
 0x178   : > { %v2329_v35 = vpop.f32.mrf.mxu0 }
 0x179   : > { %v2393_v36 = vpop.f32.mrf.mxu1 }
 0x17a   : > { %v2330_v38 = vpop.f32.mrf.mxu0 }
 0x17b   : > { %v2331_v39 = vadd.f32 %v2330_v38, %v2329_v35  ;;  %v2394_v40 = vpop.f32.mrf.mxu1 }
 0x17c   : > { %v2395_v41 = vadd.f32 %v2394_v40, %v2393_v36  ;;  %v3376_v42 = vpop.f32.mrf.mxu0 }
 0x17d   : > { %v1020_v43 = vadd.f32 %v2331_v39, %v3345_v37  ;;  %v3379_v44 = vpop.f32.mrf.mxu1 }
 0x17e   : > { %v3381_v45 = vpop.f32.mrf.mxu0 }
 0x17f   : > { %v3383_v46 = vadd.f32 %v2395_v41, %v1020_v43  ;;  %v3385_v48 = vpop.f32.mrf.mxu1 }
 0x180   : > { %v2335_v49 = vpop.f32.mrf.mxu0 }
 0x181   : > { %v2399_v50 = vpop.f32.mrf.mxu1 }
 0x182   : > { %v2336_v51 = vpop.f32.mrf.mxu0 }
 0x183   : > { %v2337_v52 = vadd.f32 %v2336_v51, %v2335_v49  ;;  %v2400_v53 = vpop.f32.mrf.mxu1 }
 0x184   : > { %v2401_v54 = vadd.f32 %v2400_v53, %v2399_v50  ;;  %v3387_v55 = vpop.f32.mrf.mxu0 }
 0x185   : > { %v1028_v57 = vadd.f32 %v2337_v52, %v3345_v37  ;;  %v3390_v58 = vpop.f32.mrf.mxu1 }
 0x186   : > { %v3392_v59 = vpop.f32.mrf.mxu0 }
 0x187   : > { %v3394_v60 = vadd.f32 %v2401_v54, %v1028_v57  ;;  %v3396_v61 = vpop.f32.mrf.mxu1 }
 0x188   : > { %v3398_v62 = vpop.f32.mrf.mxu0 }
 0x189   : > { %v3400_v63 = vpop.f32.mrf.mxu1 }
 0x18a   : > { %v3402_v0 = vpop.f32.mrf.mxu0 }
 0x18b   : > { %v3404_v2 = vpop.f32.mrf.mxu1 }
 0x18c   : > { %v3406_v3 = vpop.f32.mrf.mxu0 }
 0x18d   : > { %v3408_v4 = vpop.f32.mrf.mxu1 }
 0x18e   : > { %v3410_v5 = vpop.f32.mrf.mxu0 }
 0x18f   : > { %v3412_v6 = vpop.f32.mrf.mxu1 }
 0x190   : > { %v3414_v7 = vpop.f32.mrf.mxu0 }
 0x191   : > { %v3416_v8 = vpop.f32.mrf.mxu1 }
 0x192   : > { %3738 = vst [vmem:[#allocation15_spill] sm:$0xff] %v3416_v8  ;;  %v3418_v10 = vpop.f32.mrf.mxu0 }
 0x193   : > { %v3420_v11 = vpop.f32.mrf.mxu1 }
 0x194   : > { %3739 = vst [vmem:[#allocation16_spill] sm:$0xff] %v3420_v11  ;;  %v3422_v12 = vpop.f32.mrf.mxu0 }
 0x195   : > { %v3424_v13 = vpop.f32.mrf.mxu1 }
 0x196   : > { %v3426_v14 = vpop.f32.mrf.mxu0 }
 0x197   : > { %v3428_v15 = vpop.f32.mrf.mxu1 }
 0x198   : > { %v2433_v16 = vpop.f32.mrf.mxu0 }
 0x199   : > { %v3430_v18 = vpop.f32.mrf.mxu1 }
 0x19a   : > { %v2434_v19 = vpop.f32.mrf.mxu0 }
 0x19b   : > { %v3432_v20 = vpop.f32.mrf.mxu1  ;;  %v2435_v41 = vadd.f32 %v2434_v19, %v2433_v16  ;;  %v2328_v19 = vadd.f32 %v3370_v32, %v3365_v29 }
 0x19c   : > { %v2436_v21 = vpop.f32.mrf.mxu0 }
 0x19d   : > { %v3434_v22 = vpop.f32.mrf.mxu1 }
 0x19e   : > { %v2437_v23 = vpop.f32.mrf.mxu0 }
 0x19f   : > { %v3436_v24 = vpop.f32.mrf.mxu1  ;;  %v2438_v51 = vadd.f32 %v2437_v23, %v2436_v21 }
 0x1a0   : > { %v2439_v26 = vpop.f32.mrf.mxu0 }
 0x1a1   : > { %v3438_v27 = vpop.f32.mrf.mxu1  ;;  %v1185_v16 = vadd.f32 %v2438_v51, %v3351_v56  ;;  %v2392_v56 = vadd.f32 %v3374_v34, %v3368_v31 }
 0x1a2   : > { %3740 = vst [vmem:[#allocation17_spill] sm:$0xff] %v3438_v27  ;;  %v2440_v28 = vpop.f32.mrf.mxu0  ;;  %v1182_v27 = vadd.f32 %v2435_v41, %v3348_v47 }
 0x1a3   : > { %v3440_v30 = vpop.f32.mrf.mxu1  ;;  %v2441_v38 = vadd.f32 %v2440_v28, %v2439_v26 }
 0x1a4   : > { %3741 = vst [vmem:[#allocation18_spill] sm:$0xff] %v3440_v30  ;;  %v2442_v35 = vpop.f32.mrf.mxu0 }
 0x1a5   : > { %v3442_v36 = vpop.f32.mrf.mxu1  ;;  %v1190_v52 = vadd.f32 %v2441_v38, %v3354_v1 }
 0x1a6   : > { %3742 = vst [vmem:[#allocation19_spill] sm:$0xff] %v3442_v36  ;;  %v2443_v39 = vpop.f32.mrf.mxu0 }
 0x1a7   : > { %v3444_v40 = vpop.f32.mrf.mxu1  ;;  %v2444_v43 = vadd.f32 %v2443_v39, %v2442_v35 }
 0x1a8   : > { %v2445_v49 = vpop.f32.mrf.mxu0 }
 0x1a9   : > { %v2526_v50 = vpop.f32.mrf.mxu1  ;;  %v1193_v11 = vadd.f32 %v2444_v43, %v3357_v9 }
 0x1aa   : > { %v2446_v53 = vpop.f32.mrf.mxu0  ;;  %v1287_v57 = vadd.f32 %v2526_v50, %v1190_v52 }
 0x1ab   : > { %v1278_v54 = vpop.f32.mrf.mxu1  ;;  %v2447_v1 = vadd.f32 %v2446_v53, %v2445_v49 }
 0x1ac   : > { %v2448_v30 = vpop.f32.mrf.mxu0  ;;  %v1279_v26 = vadd.f32 %v1278_v54, %v1182_v27  ;;  %v1343_v23 = vmax.f32 %v1287_v57, 0.0 }
 0x1ad   : > { %v2527_v36 = vpop.f32.mrf.mxu1  ;;  %v1198_v32 = vadd.f32 %v2447_v1, %v3360_v17 }
 0x1ae   : > { %v1290_v28 = vadd.f32 %v2527_v36, %v1193_v11  ;;  %v2449_v8 = vpop.f32.mrf.mxu0  ;;  %v1341_v47 = vmax.f32 %v1279_v26, 0.0  ;;  %v1015_v11 = vadd.f32 %v2328_v19, %v3345_v37  ;;  %v2334_v26 = vadd.f32 %v3381_v45, %v3376_v42 }
 0x1af   : > { %v1281_v21 = vpop.f32.mrf.mxu1  ;;  %v2450_v52 = vadd.f32 %v2449_v8, %v2448_v30  ;;  %v2346_v45 = vadd.f32 %v3410_v5, %v3406_v3  ;;  %v2410_v5 = vadd.f32 %v3412_v6, %v3408_v4  ;;  %v2352_v4 = vadd.f32 %v3426_v14, %v3422_v12 }
 0x1b0   : > { %v1344_v35 = vmax.f32 %v1290_v28, 0.0  ;;  %v1282_v38 = vadd.f32 %v1281_v21, %v1185_v16  ;;  %v2451_v39 = vpop.f32.mrf.mxu0  ;;  %v1112_v30 = vadd.f32 %v2392_v56, %v1015_v11  ;;  %v2340_v11 = vadd.f32 %v3392_v59, %v3387_v55 }
 0x1b1   : > { %v2530_v50 = vpop.f32.mrf.mxu1  ;;  %v1201_v8 = vadd.f32 %v2450_v52, %v3363_v25  ;;  %v2398_v25 = vadd.f32 %v3385_v48, %v3379_v44  ;;  %v2343_v56 = vadd.f32 %v3402_v0, %v3398_v62  ;;  %v1039_v3 = vadd.f32 %v2346_v45, %v3345_v37 }
 0x1b2   : > { %v1358_v41 = vpack.c.bf16 %v1344_v35, %v1343_v23  ;;  %v1342_v9 = vmax.f32 %v1282_v38, 0.0  ;;  %v2452_v43 = vpop.f32.mrf.mxu0  ;;  %v1023_v35 = vadd.f32 %v2334_v26, %v3345_v37  ;;  %v1031_v62 = vadd.f32 %v2340_v11, %v3345_v37 }
 0x1b3   : > { %v2453_v27 = vadd.f32 %v2452_v43, %v2451_v39  ;;  %v1294_v36 = vpop.f32.mrf.mxu1  ;;  %v1036_v0 = vadd.f32 %v2343_v56, %v3345_v37  ;;  %v2349_v26 = vadd.f32 %v3418_v10, %v3414_v7  ;;  %v1047_v14 = vadd.f32 %v2352_v4, %v3345_v37 }
 0x1b4   : > { %v1357_v29 = vpack.c.bf16 %v1342_v9, %v1341_v47  ;;  %v2454_v49 = vpop.f32.mrf.mxu0  ;;  %v1295_v54 = vadd.f32 %v1294_v36, %v1198_v32  ;;  %v1120_v48 = vadd.f32 %v2398_v25, %v1023_v35 }
 0x1b5   : > { %v1206_v51 = vadd.f32 %v2453_v27, %v3372_v33  ;;  %v2531_v53 = vpop.f32.mrf.mxu1 }
 0x1b6   : > { %2556 = vmatprep.mubr.bf16.mxu1 %v1357_v29  ;;  %v2455_v57 = vpop.f32.mrf.mxu0  ;;  %v1345_v33 = vmax.f32 %v1295_v54, 0.0 }
 0x1b7   : > { %v2456_v28 = vadd.f32 %v2455_v57, %v2454_v49  ;;  %v1297_v31 = vpop.f32.mrf.mxu1  ;;  %2557 = vmatmul.mubr.bf16.vlgmr.msra.gmra.mxu1 %v1358_v41  ;;  %v1303_v19 = vadd.f32 %v2530_v50, %v1206_v51  ;;  %v2407_v51 = vadd.f32 %v3404_v2, %v3400_v63  ;;  %v1136_v57 = vadd.f32 %v2410_v5, %v1039_v3  ;;  %v2761_v3 = vld [vmem:[#allocation8 + $0x10] sm:$0xff]   ;;  %v2763_v5 = vld [vmem:[#allocation8] sm:$0xff]  }
 0x1b8   : > { %v1298_v34 = vadd.f32 %v1297_v31, %v1201_v8  ;;  %v2457_v16 = vpop.f32.mrf.mxu0  ;;  %v2471_v8 = vadd.f32 %v3432_v20, %v3430_v18  ;;  %2582 = vmatprep.subr.bf16.mxu0 %v2761_v3 }
 0x1b9   : > { %v1209_v17 = vadd.f32 %v2456_v28, %v1112_v30  ;;  %v3460_v21 = vpop.f32.mrf.mxu1  ;;  %v1347_v50 = vmax.f32 %v1303_v19, 0.0  ;;  %v1133_v31 = vadd.f32 %v2407_v51, %v1036_v0  ;;  %2583 = vmatpush3.bf16.msra.mxu0 %v2761_v3 }
 0x1ba   : > { %v1346_v23 = vmax.f32 %v1298_v34, 0.0  ;;  %v2458_v1 = vpop.f32.mrf.mxu0 }
 0x1bb   : > { %v1306_v38 = vadd.f32 %v2531_v53, %v1209_v17  ;;  %v2459_v39 = vadd.f32 %v2458_v1, %v2457_v16  ;;  %v1310_v42 = vpop.f32.mrf.mxu1  ;;  %v2474_v53 = vadd.f32 %v3436_v24, %v3434_v22  ;;  %v2416_v16 = vadd.f32 %v3428_v15, %v3424_v13  ;;  %v3743_v17 = vld [vmem:[#allocation15_spill] sm:$0xff]  ;;  %v3746_v13 = vld [vmem:[#allocation17_spill] sm:$0xff]  ;;  %v3747_v15 = vld [vmem:[#allocation18_spill] sm:$0xff] }
 0x1bc   : > { %v1359_v47 = vpack.c.bf16 %v1346_v23, %v1345_v33  ;;  %v2460_v41 = vpop.f32.mrf.mxu0  ;;  %v3744_v33 = vld [vmem:[#allocation16_spill] sm:$0xff]  ;;  %v1230_v10 = vadd.f32 %v2471_v8, %v1133_v31  ;;  %v3745_v1 = vld [vmem:[#allocation19_spill] sm:$0xff]  ;;  %v2477_v45 = vadd.f32 %v3747_v15, %v3746_v13 }
 0x1bd   : > { %v1348_v52 = vmax.f32 %v1306_v38, 0.0  ;;  %v1214_v9 = vadd.f32 %v2459_v39, %v3383_v46  ;;  %v2535_v43 = vpop.f32.mrf.mxu1  ;;  %v2404_v46 = vadd.f32 %v3396_v61, %v3390_v58  ;;  %v1233_v12 = vadd.f32 %v2474_v53, %v1136_v57 }
 0x1be   : > { %2560 = vmatprep.mubr.bf16.mxu1 %v1359_v47  ;;  %v2461_v44 = vpop.f32.mrf.mxu0  ;;  %v2413_v7 = vadd.f32 %v3744_v33, %v3743_v17  ;;  %v2480_v35 = vadd.f32 %v3444_v40, %v3745_v1 }
 0x1bf   : > { %v2462_v27 = vadd.f32 %v2461_v44, %v2460_v41  ;;  %v1313_v36 = vpop.f32.mrf.mxu1  ;;  %v1360_v29 = vpack.c.bf16 %v1348_v52, %v1347_v50  ;;  %v1311_v49 = vadd.f32 %v1310_v42, %v1214_v9  ;;  %v1128_v24 = vadd.f32 %v2404_v46, %v1031_v62 }
 0x1c0   : > { %v2463_v32 = vpop.f32.mrf.mxu0  ;;  %v1144_v42 = vadd.f32 %v2416_v16, %v1047_v14 }
 0x1c1   : > { %v1217_v55 = vadd.f32 %v2462_v27, %v1120_v48  ;;  %v2538_v59 = vpop.f32.mrf.mxu1  ;;  %2561 = vmatmul.mubr.bf16.gmra.mxu1 %v1360_v29  ;;  %v1349_v28 = vmax.f32 %v1311_v49, 0.0  ;;  %v2182_v49 = vld [vmem:[%s3719_s4] ss:$0 sm:$0xff] }
 0x1c2   : > { %v2464_v54 = vpop.f32.mrf.mxu0  ;;  %v1241_v9 = vadd.f32 %v2480_v35, %v1144_v42 }
 0x1c3   : > { %v1314_v6 = vadd.f32 %v1313_v36, %v1217_v55  ;;  %v2465_v58 = vadd.f32 %v2464_v54, %v2463_v32  ;;  %v1326_v61 = vpop.f32.mrf.mxu1 }
 0x1c4   : > { %v2466_v30 = vpop.f32.mrf.mxu0  ;;  %v1327_v39 = vadd.f32 %v1326_v61, %v1230_v10 }
 0x1c5   : > { %v1350_v63 = vmax.f32 %v1314_v6, 0.0  ;;  %v1222_v2 = vadd.f32 %v2465_v58, %v3394_v60  ;;  %v2539_v22 = vpop.f32.mrf.mxu1  ;;  %v1044_v60 = vadd.f32 %v2349_v26, %v3345_v37 }
 0x1c6   : > { %v2467_v34 = vpop.f32.mrf.mxu0  ;;  %v1353_v56 = vmax.f32 %v1327_v39, 0.0  ;;  %v1338_v44 = vadd.f32 %v2539_v22, %v1241_v9 }
 0x1c7   : > { %v1361_v19 = vpack.c.bf16 %v1350_v63, %v1349_v28  ;;  %v2468_v18 = vadd.f32 %v2467_v34, %v2466_v30  ;;  %v1329_v20 = vpop.f32.mrf.mxu1  ;;  %v1319_v25 = vadd.f32 %v3460_v21, %v1222_v2  ;;  %v1141_v50 = vadd.f32 %v2413_v7, %v1044_v60 }
 0x1c8   : > { %v1330_v23 = vadd.f32 %v1329_v20, %v1233_v12  ;;  %v1356_v21 = vmax.f32 %v1338_v44, 0.0 }
 0x1c9   : > { %v1225_v38 = vadd.f32 %v2468_v18, %v1128_v24  ;;  %2564 = vmatprep.mubr.bf16.mxu1 %v1361_v19  ;;  %v1351_v52 = vmax.f32 %v1319_v25, 0.0  ;;  %v1238_v37 = vadd.f32 %v2477_v45, %v1141_v50 }
 0x1ca   : > { %v1354_v41 = vmax.f32 %v1330_v23, 0.0 }
 0x1cb   : > { %v1322_v47 = vadd.f32 %v2535_v43, %v1225_v38  ;;  %v1335_v27 = vadd.f32 %v2538_v59, %v1238_v37  ;;  %v2762_v43 = vld [vmem:[#allocation8 + $0x8] sm:$0xff]  }
 0x1cc   : > { %v1363_v40 = vpack.c.bf16 %v1354_v41, %v1353_v56  ;;  %2584 = vmatprep.subr.bf16.mxu0 %v2762_v43 }
 0x1cd   : > { %v1352_v11 = vmax.f32 %v1322_v47, 0.0  ;;  %v1355_v36 = vmax.f32 %v1335_v27, 0.0  ;;  %2585 = vmatpush3.bf16.msra.mxu0 %v2762_v43  ;;  %v1725_v27 = vlaneseq }
 0x1ce   : > { %2586 = vmatprep.subr.bf16.mxu0 %v2763_v5 }
 0x1cf   : > { %v1362_v48 = vpack.c.bf16 %v1352_v11, %v1351_v52  ;;  %v1364_v29 = vpack.c.bf16 %v1356_v21, %v1355_v36  ;;  %v3504_v21 = vand.u32 127, %v1725_v27  ;;  %v2191_v36 = vld [vmem:[%s3721_s6] ss:$0 sm:$0xff] }
 0x1d1   : > { %2565 = vmatmul.mubr.bf16.gmra.mxu1 %v1362_v48  ;;  %2587 = vmatpush3.bf16.msra.mxu0 %v2763_v5  ;;  %vm1727_vm1 = vcmp.lt.s32.totalorder %v3504_v21, 10 }
 0x1d2   : > { %2568 = vmatprep.mubr.bf16.mxu1 %v1363_v40 }
 0x1d9   : > { %2569 = vmatmul.mubr.bf16.gmra.mxu1 %v1364_v29 }
 0x277   : > { %v2558_v32 = vpop.f32.mrf.mxu1 }
 0x278   : > { %v1479_v0 = vadd.f32 %v2558_v32, %v2182_v49 }
 0x279   : > { %v1470_v46 = vpop.f32.mrf.mxu1 }
 0x27a   : > { %v1471_v59 = vadd.f32 %v2182_v49, %v1470_v46  ;;  %v1535_v58 = vmax.f32 %v1479_v0, 0.0 }
 0x27b   : > { %v2559_v55 = vpop.f32.mrf.mxu1 }
 0x27c   : > { %v1482_v62 = vadd.f32 %v2559_v55, %v2182_v49  ;;  %v1533_v4 = vmax.f32 %v1471_v59, 0.0 }
 0x27d   : > { %v1473_v51 = vpop.f32.mrf.mxu1 }
 0x27e   : > { %v1474_v53 = vadd.f32 %v2182_v49, %v1473_v51  ;;  %v1536_v54 = vmax.f32 %v1482_v62, 0.0 }
 0x280   : > { %v1534_v6 = vmax.f32 %v1474_v53, 0.0  ;;  %v1550_v8 = vpack.c.bf16 %v1536_v54, %v1535_v58 }
 0x281   : > { %v2562_v61 = vpop.f32.mrf.mxu1 }
 0x282   : > { %v1549_v57 = vpack.c.bf16 %v1534_v6, %v1533_v4  ;;  %v1495_v2 = vadd.f32 %v2562_v61, %v2182_v49 }
 0x283   : > { %v1486_v30 = vpop.f32.mrf.mxu1 }
 0x284   : > { %2588 = vmatprep.mubr.bf16.mxu0 %v1549_v57  ;;  %v1487_v28 = vadd.f32 %v2182_v49, %v1486_v30  ;;  %v1539_v14 = vmax.f32 %v1495_v2, 0.0 }
 0x285   : > { %2589 = vmatmul.mubr.bf16.vlgmr.msra.gmra.mxu0 %v1550_v8  ;;  %v2563_v26 = vpop.f32.mrf.mxu1 }
 0x286   : > { %v1498_v63 = vadd.f32 %v2563_v26, %v2182_v49  ;;  %v1537_v34 = vmax.f32 %v1487_v28, 0.0 }
 0x287   : > { %v1489_v22 = vpop.f32.mrf.mxu1 }
 0x288   : > { %v1490_v24 = vadd.f32 %v2182_v49, %v1489_v22  ;;  %v1540_v31 = vmax.f32 %v1498_v63, 0.0 }
 0x28a   : > { %v1538_v12 = vmax.f32 %v1490_v24, 0.0  ;;  %v1552_v19 = vpack.c.bf16 %v1540_v31, %v1539_v14 }
 0x28c   : > { %v1551_v16 = vpack.c.bf16 %v1538_v12, %v1537_v34 }
 0x28e   : > { %2592 = vmatprep.mubr.bf16.mxu0 %v1551_v16 }
 0x28f   : > { %2593 = vmatmul.mubr.bf16.gmra.mxu0 %v1552_v19 }
 0x291   : > { %v2566_v18 = vpop.f32.mrf.mxu1 }
 0x292   : > { %v1511_v10 = vadd.f32 %v2566_v18, %v2182_v49 }
 0x293   : > { %v1502_v20 = vpop.f32.mrf.mxu1 }
 0x294   : > { %v1503_v33 = vadd.f32 %v2182_v49, %v1502_v20  ;;  %v1543_v39 = vmax.f32 %v1511_v10, 0.0 }
 0x295   : > { %v2567_v17 = vpop.f32.mrf.mxu1 }
 0x296   : > { %v1514_v7 = vadd.f32 %v2567_v17, %v2182_v49  ;;  %v1541_v25 = vmax.f32 %v1503_v33, 0.0 }
 0x297   : > { %v1505_v23 = vpop.f32.mrf.mxu1 }
 0x298   : > { %v1506_v60 = vadd.f32 %v2182_v49, %v1505_v23  ;;  %v1544_v1 = vmax.f32 %v1514_v7, 0.0 }
 0x299   : > { %v2570_v35 = vpop.f32.mrf.mxu1 }
 0x29a   : > { %v1542_v38 = vmax.f32 %v1506_v60, 0.0  ;;  %v1554_v15 = vpack.c.bf16 %v1544_v1, %v1543_v39  ;;  %v1527_v50 = vadd.f32 %v2570_v35, %v2182_v49 }
 0x29b   : > { %v1518_v42 = vpop.f32.mrf.mxu1 }
 0x29c   : > { %v1553_v13 = vpack.c.bf16 %v1542_v38, %v1541_v25  ;;  %v1519_v47 = vadd.f32 %v2182_v49, %v1518_v42  ;;  %v1547_v44 = vmax.f32 %v1527_v50, 0.0 }
 0x29d   : > { %v2571_v45 = vpop.f32.mrf.mxu1 }
 0x29e   : > { %v1530_v41 = vadd.f32 %v2571_v45, %v2182_v49  ;;  %2596 = vmatprep.mubr.bf16.mxu0 %v1553_v13  ;;  %v1545_v56 = vmax.f32 %v1519_v47, 0.0 }
 0x29f   : > { %v1521_v52 = vpop.f32.mrf.mxu1  ;;  %2597 = vmatmul.mubr.bf16.gmra.mxu0 %v1554_v15 }
 0x2a0   : > { %v1522_v9 = vadd.f32 %v2182_v49, %v1521_v52  ;;  %v1548_v11 = vmax.f32 %v1530_v41, 0.0 }
 0x2a2   : > { %v1546_v37 = vmax.f32 %v1522_v9, 0.0  ;;  %v1556_v40 = vpack.c.bf16 %v1548_v11, %v1547_v44 }
 0x2a4   : > { %v1555_v48 = vpack.c.bf16 %v1546_v37, %v1545_v56 }
 0x2a6   : > { %2600 = vmatprep.mubr.bf16.mxu0 %v1555_v48 }
 0x2a7   : > { %2601 = vmatmul.mubr.bf16.gmra.mxu0 %v1556_v40 }
 0x345   : > { %v2590_v29 = vpop.f32.mrf.mxu0 }
 0x346   : > { %v1671_v3 = vadd.f32 %v2590_v29, %v2191_v36 }
 0x347   : > { %v1662_v43 = vpop.f32.mrf.mxu0 }
 0x348   : > { %v1663_v5 = vadd.f32 %v2191_v36, %v1662_v43  ;;  %v1730_v32 = vsel %vm1727_vm1, %v1671_v3, -inf }
 0x349   : > { %1748 = vmax.xlane.f32.xlu1 %v1730_v32  ;;  %v2591_v46 = vpop.f32.mrf.mxu0 }
 0x34a   : > { %v1674_v49 = vadd.f32 %v2591_v46, %v2191_v36  ;;  %v1728_v55 = vsel %vm1727_vm1, %v1663_v5, -inf }
 0x34b   : > { %v1665_v59 = vpop.f32.mrf.mxu0  ;;  %1744 = vmax.xlane.f32.xlu0 %v1728_v55 }
 0x34c   : > { %v1666_v62 = vadd.f32 %v2191_v36, %v1665_v59  ;;  %v1731_v0 = vsel %vm1727_vm1, %v1674_v49, -inf }
 0x34d   : > { %1750 = vmax.xlane.f32.xlu1 %v1731_v0 }
 0x34e   : > { %v1729_v51 = vsel %vm1727_vm1, %v1666_v62, -inf }
 0x34f   : > { %1746 = vmax.xlane.f32.xlu0 %v1729_v51  ;;  %v2594_v53 = vpop.f32.mrf.mxu0 }
 0x350   : > { %v1687_v54 = vadd.f32 %v2594_v53, %v2191_v36 }
 0x351   : > { %v1678_v4 = vpop.f32.mrf.mxu0 }
 0x352   : > { %v1679_v6 = vadd.f32 %v2191_v36, %v1678_v4  ;;  %v1734_v58 = vsel %vm1727_vm1, %v1687_v54, -inf }
 0x353   : > { %v2595_v61 = vpop.f32.mrf.mxu0  ;;  %1756 = vmax.xlane.f32.xlu0 %v1734_v58 }
 0x354   : > { %v1690_v57 = vadd.f32 %v2595_v61, %v2191_v36  ;;  %v1732_v28 = vsel %vm1727_vm1, %v1679_v6, -inf }
 0x355   : > { %v1681_v8 = vpop.f32.mrf.mxu0 }
 0x356   : > { %v1682_v30 = vadd.f32 %v2191_v36, %v1681_v8  ;;  %v1735_v26 = vsel %vm1727_vm1, %v1690_v57, -inf }
 0x357   : > { %1758 = vmax.xlane.f32.xlu1 %v1735_v26  ;;  %1752 = vmax.xlane.f32.xlu0 %v1732_v28 }
 0x358   : > { %v3526_v63 = vsel %vm1727_vm1, %v1682_v30, -inf }
 0x35b   : > { %1754 = vmax.xlane.f32.xlu1 %v3526_v63 }
 0x35f   : > { %v2598_v2 = vpop.f32.mrf.mxu0 }
 0x360   : > { %v1703_v22 = vadd.f32 %v2598_v2, %v2191_v36 }
 0x361   : > { %v1694_v24 = vpop.f32.mrf.mxu0 }
 0x362   : > { %v1695_v31 = vadd.f32 %v2191_v36, %v1694_v24  ;;  %v3531_v34 = vsel %vm1727_vm1, %v1703_v22, -inf }
 0x363   : > { %v2599_v12 = vpop.f32.mrf.mxu0  ;;  %1764 = vmax.xlane.f32.xlu0 %v3531_v34 }
 0x364   : > { %v1706_v14 = vadd.f32 %v2599_v12, %v2191_v36  ;;  %v3540_v20 = vsel %vm1727_vm1, %v1695_v31, -inf }
 0x365   : > { %v1697_v16 = vpop.f32.mrf.mxu0 }
 0x366   : > { %v1698_v19 = vadd.f32 %v2191_v36, %v1697_v16  ;;  %v3536_v18 = vsel %vm1727_vm1, %v1706_v14, -inf }
 0x367   : > { %v2602_v17 = vpop.f32.mrf.mxu0  ;;  %1766 = vmax.xlane.f32.xlu1 %v3536_v18  ;;  %1760 = vmax.xlane.f32.xlu0 %v3540_v20 }
 0x368   : > { %v3546_v10 = vsel %vm1727_vm1, %v1698_v19, -inf  ;;  %v1719_v60 = vadd.f32 %v2602_v17, %v2191_v36 }
 0x369   : > { %v1710_v33 = vpop.f32.mrf.mxu0 }
 0x36a   : > { %v1711_v7 = vadd.f32 %v2191_v36, %v1710_v33  ;;  %v3560_v42 = vsel %vm1727_vm1, %v1719_v60, -inf }
 0x36b   : > { %v2603_v23 = vpop.f32.mrf.mxu0  ;;  %1762 = vmax.xlane.f32.xlu1 %v3546_v10 }
 0x36c   : > { %v3551_v1 = vsel %vm1727_vm1, %v1711_v7, -inf  ;;  %v1722_v38 = vadd.f32 %v2603_v23, %v2191_v36 }
 0x36d   : > { %v1713_v35 = vpop.f32.mrf.mxu0  ;;  %1768 = vmax.xlane.f32.xlu0 %v3551_v1 }
 0x36e   : > { %v1714_v25 = vadd.f32 %v2191_v36, %v1713_v35  ;;  %v3566_v13 = vsel %vm1727_vm1, %v1722_v38, -inf }
 0x370   : > { %v3556_v39 = vsel %vm1727_vm1, %v1714_v25, -inf }
 0x371   : > { %1770 = vmax.xlane.f32.xlu1 %v3556_v39  ;;  %1772 = vmax.xlane.f32.xlu0 %v3560_v42 }
 0x375   : > { %1774 = vmax.xlane.f32.xlu1 %v3566_v13 }
 0x3d2   : > { %v1749_v15 = vpop.xlane.xlu1 %1748 }
 0x3d3   : > { %v3569_v45 = vsub.f32 %v1730_v32, %v1749_v15 }
 0x3d4   : > { %v1745_v47 = vpop.xlane.xlu0 %1744 }
 0x3d5   : > { %v1796_v41 = vmul.f32 1.442695, %v3569_v45  ;;  %v3572_v50 = vsub.f32 %v1728_v55, %v1745_v47 }
 0x3d6   : > { %v1751_v52 = vpop.xlane.xlu1 %1750 }
 0x3d7   : > { %2764 = vpow2.f32 %v1796_v41  ;;  %v1792_v9 = vmul.f32 1.442695, %v3572_v50  ;;  %v3575_v11 = vsub.f32 %v1731_v0, %v1751_v52 }
 0x3d8   : > { %v1747_v56 = vpop.xlane.xlu0 %1746 }
 0x3d9   : > { %v1798_v37 = vmul.f32 1.442695, %v3575_v11  ;;  %v3578_v44 = vsub.f32 %v1729_v51, %v1747_v56  ;;  %2766 = vpow2.f32 %v1792_v9 }
 0x3db   : > { %2768 = vpow2.f32 %v1798_v37  ;;  %v1794_v48 = vmul.f32 1.442695, %v3578_v44 }
 0x3dc   : > { %v1757_v40 = vpop.xlane.xlu0 %1756 }
 0x3dd   : > { %v3581_v27 = vsub.f32 %v1734_v58, %v1757_v40  ;;  %2770 = vpow2.f32 %v1794_v48 }
 0x3df   : > { %v1804_v21 = vmul.f32 1.442695, %v3581_v27 }
 0x3e0   : > { %v1759_v36 = vpop.xlane.xlu1 %1758  ;;  %v1753_v29 = vpop.xlane.xlu0 %1752 }
 0x3e1   : > { %2772 = vpow2.f32 %v1804_v21  ;;  %v3584_v3 = vsub.f32 %v1735_v26, %v1759_v36  ;;  %v3586_v43 = vsub.f32 %v1732_v28, %v1753_v29 }
 0x3e3   : > { %v1806_v5 = vmul.f32 1.442695, %v3584_v3  ;;  %v1800_v32 = vmul.f32 1.442695, %v3586_v43 }
 0x3e4   : > { %v2765_v46 = vpop.eup %2764  ;;  %v1755_v49 = vpop.xlane.xlu1 %1754 }
 0x3e5   : > { %2774 = vpow2.f32 %v1806_v5  ;;  %v3591_v55 = vsub.f32 %v3526_v63, %v1755_v49  ;;  %1828 = vadd.xlane.f32.xlu0 %v2765_v46 }
 0x3e6   : > { %2776 = vpow2.f32 %v1800_v32  ;;  %v2767_v59 = vpop.eup %2766 }
 0x3e7   : > { %v1802_v62 = vmul.f32 1.442695, %v3591_v55 }
 0x3e8   : > { %v2769_v0 = vpop.eup %2768 }
 0x3e9   : > { %2778 = vpow2.f32 %v1802_v62  ;;  %1830 = vadd.xlane.f32.xlu1 %v2769_v0  ;;  %1824 = vadd.xlane.f32.xlu0 %v2767_v59 }
 0x3ea   : > { %v2771_v51 = vpop.eup %2770 }
 0x3ec   : > { %v1765_v53 = vpop.xlane.xlu0 %1764 }
 0x3ed   : > { %1826 = vadd.xlane.f32.xlu1 %v2771_v51  ;;  %v3595_v54 = vsub.f32 %v3531_v34, %v1765_v53 }
 0x3ee   : > { %v2773_v4 = vpop.eup %2772 }
 0x3ef   : > { %v1812_v6 = vmul.f32 1.442695, %v3595_v54  ;;  %1836 = vadd.xlane.f32.xlu0 %v2773_v4 }
 0x3f0   : > { %v1767_v58 = vpop.xlane.xlu1 %1766  ;;  %v1761_v61 = vpop.xlane.xlu0 %1760 }
 0x3f1   : > { %2780 = vpow2.f32 %v1812_v6  ;;  %v3599_v57 = vsub.f32 %v3536_v18, %v1767_v58  ;;  %v3602_v8 = vsub.f32 %v3540_v20, %v1761_v61 }
 0x3f2   : > { %v2775_v30 = vpop.eup %2774 }
 0x3f3   : > { %v2777_v26 = vpop.eup %2776  ;;  %v1814_v28 = vmul.f32 1.442695, %v3599_v57  ;;  %v1808_v63 = vmul.f32 1.442695, %v3602_v8  ;;  %1838 = vadd.xlane.f32.xlu1 %v2775_v30 }
 0x3f4   : > { %1832 = vadd.xlane.f32.xlu0 %v2777_v26  ;;  %v1763_v2 = vpop.xlane.xlu1 %1762 }
 0x3f5   : > { %2782 = vpow2.f32 %v1814_v28  ;;  %v3607_v22 = vsub.f32 %v3546_v10, %v1763_v2 }
 0x3f6   : > { %v2779_v24 = vpop.eup %2778  ;;  %2784 = vpow2.f32 %v1808_v63  ;;  %v1769_v31 = vpop.xlane.xlu0 %1768 }
 0x3f7   : > { %v1810_v34 = vmul.f32 1.442695, %v3607_v22  ;;  %v3611_v12 = vsub.f32 %v3551_v1, %v1769_v31  ;;  %1834 = vadd.xlane.f32.xlu1 %v2779_v24 }
 0x3f9   : > { %2786 = vpow2.f32 %v1810_v34  ;;  %v1816_v14 = vmul.f32 1.442695, %v3611_v12 }
 0x3fa   : > { %v1771_v16 = vpop.xlane.xlu1 %1770  ;;  %v1773_v19 = vpop.xlane.xlu0 %1772 }
 0x3fb   : > { %2788 = vpow2.f32 %v1816_v14  ;;  %v3615_v18 = vsub.f32 %v3556_v39, %v1771_v16  ;;  %v3618_v20 = vsub.f32 %v3560_v42, %v1773_v19 }
 0x3fd   : > { %v1818_v17 = vmul.f32 1.442695, %v3615_v18  ;;  %v1820_v33 = vmul.f32 1.442695, %v3618_v20 }
 0x3fe   : > { %v2781_v7 = vpop.eup %2780  ;;  %v1775_v10 = vpop.xlane.xlu1 %1774 }
 0x3ff   : > { %2790 = vpow2.f32 %v1818_v17  ;;  %v3623_v23 = vsub.f32 %v3566_v13, %v1775_v10  ;;  %1844 = vadd.xlane.f32.xlu0 %v2781_v7 }
 0x400   : > { %2792 = vpow2.f32 %v1820_v33 }
 0x401   : > { %v1822_v60 = vmul.f32 1.442695, %v3623_v23 }
 0x402   : > { %v2783_v1 = vpop.eup %2782 }
 0x403   : > { %v2785_v35 = vpop.eup %2784  ;;  %2794 = vpow2.f32 %v1822_v60  ;;  %1846 = vadd.xlane.f32.xlu1 %v2783_v1 }
 0x404   : > { %1840 = vadd.xlane.f32.xlu0 %v2785_v35 }
 0x406   : > { %v2787_v25 = vpop.eup %2786 }
 0x407   : > { %1842 = vadd.xlane.f32.xlu1 %v2787_v25 }
 0x408   : > { %v2789_v38 = vpop.eup %2788 }
 0x409   : > { %1848 = vadd.xlane.f32.xlu0 %v2789_v38 }
 0x40c   : > { %v2791_v39 = vpop.eup %2790 }
 0x40d   : > { %v2793_v42 = vpop.eup %2792  ;;  %1850 = vadd.xlane.f32.xlu1 %v2791_v39 }
 0x40e   : > { %1852 = vadd.xlane.f32.xlu0 %v2793_v42 }
 0x410   : > { %v2795_v15 = vpop.eup %2794 }
 0x411   : > { %1854 = vadd.xlane.f32.xlu1 %v2795_v15 }
 0x46e   : > { %v1829_v13 = vpop.xlane.xlu0 %1828 }
 0x46f   : > { %2796 = vlog2.f32 %v1829_v13 }
 0x472   : > { %v1831_v47 = vpop.xlane.xlu1 %1830  ;;  %v1825_v41 = vpop.xlane.xlu0 %1824 }
 0x473   : > { %2798 = vlog2.f32 %v1831_v47 }
 0x474   : > { %2800 = vlog2.f32 %v1825_v41 }
 0x476   : > { %v1827_v52 = vpop.xlane.xlu1 %1826 }
 0x477   : > { %2802 = vlog2.f32 %v1827_v52 }
 0x478   : > { %v1837_v9 = vpop.xlane.xlu0 %1836 }
 0x479   : > { %2804 = vlog2.f32 %v1837_v9 }
 0x47c   : > { %v2797_v56 = vpop.eup %2796  ;;  %v1839_v37 = vpop.xlane.xlu1 %1838 }
 0x47d   : > { %2806 = vlog2.f32 %v1839_v37  ;;  %v1833_v48 = vpop.xlane.xlu0 %1832  ;;  %v1861_v40 = vmul.f32 0.6931472, %v2797_v56 }
 0x47e   : > { %2808 = vlog2.f32 %v1833_v48 }
 0x47f   : > { %v1890_v32 = vsub.f32 %v3569_v45, %v1861_v40 }
 0x480   : > { %v2799_v21 = vpop.eup %2798  ;;  %v1835_v36 = vpop.xlane.xlu1 %1834 }
 0x481   : > { %v2801_v29 = vpop.eup %2800  ;;  %v1863_v5 = vmul.f32 0.6931472, %v2799_v21  ;;  %2810 = vlog2.f32 %v1835_v36 }
 0x482   : > { %v1857_v49 = vmul.f32 0.6931472, %v2801_v29 }
 0x483   : > { %v1891_v46 = vsub.f32 %v3575_v11, %v1863_v5 }
 0x484   : > { %v2803_v59 = vpop.eup %2802  ;;  %v1888_v53 = vsub.f32 %v3572_v50, %v1857_v49 }
 0x485   : > { %v2250_v62 = vpack.c.bf16 %v1891_v46, %v1890_v32  ;;  %v1859_v0 = vmul.f32 0.6931472, %v2803_v59 }
 0x486   : > { %v2805_v51 = vpop.eup %2804 }
 0x487   : > { %2282 = vst [vmem:[%s3629_s9 + $0x8] sm:$0xff] %v2250_v62   ;;  %v1889_v4 = vsub.f32 %v3578_v44, %v1859_v0  ;;  %v1869_v61 = vmul.f32 0.6931472, %v2805_v51 }
 0x488   : > { %v1845_v6 = vpop.xlane.xlu0 %1844 }
 0x489   : > { %v2245_v58 = vpack.c.bf16 %v1889_v4, %v1888_v53  ;;  %2812 = vlog2.f32 %v1845_v6  ;;  %v1894_v28 = vsub.f32 %v3581_v27, %v1869_v61 }
 0x48a   : > { %v2807_v45 = vpop.eup %2806 }
 0x48b   : > { %v2809_v11 = vpop.eup %2808  ;;  %2246 = vst [vmem:[%s3629_s9] sm:$0xff] %v2245_v58   ;;  %v1871_v30 = vmul.f32 0.6931472, %v2807_v45 }
 0x48c   : > { %v1847_v26 = vpop.xlane.xlu1 %1846  ;;  %v1865_v2 = vmul.f32 0.6931472, %v2809_v11 }
 0x48d   : > { %v1895_v63 = vsub.f32 %v3584_v3, %v1871_v30  ;;  %2814 = vlog2.f32 %v1847_v26  ;;  %v1841_v50 = vpop.xlane.xlu0 %1840 }
 0x48e   : > { %v2811_v24 = vpop.eup %2810  ;;  %2816 = vlog2.f32 %v1841_v50  ;;  %v1892_v14 = vsub.f32 %v3586_v43, %v1865_v2 }
 0x48f   : > { %v2260_v44 = vpack.c.bf16 %v1895_v63, %v1894_v28  ;;  %v1867_v31 = vmul.f32 0.6931472, %v2811_v24 }
 0x490   : > { %v1843_v34 = vpop.xlane.xlu1 %1842 }
 0x491   : > { %2284 = vst [vmem:[%s3629_s9 + $0x18] sm:$0xff] %v2260_v44   ;;  %v1893_v16 = vsub.f32 %v3591_v55, %v1867_v31  ;;  %2818 = vlog2.f32 %v1843_v34 }
 0x492   : > { %v1849_v19 = vpop.xlane.xlu0 %1848 }
 0x493   : > { %v2255_v17 = vpack.c.bf16 %v1893_v16, %v1892_v14  ;;  %2820 = vlog2.f32 %v1849_v19 }
 0x495   : > { %2283 = vst [vmem:[%s3629_s9 + $0x10] sm:$0xff] %v2255_v17  }
 0x496   : > { %v2813_v27 = vpop.eup %2812  ;;  %v1851_v3 = vpop.xlane.xlu1 %1850 }
 0x497   : > { %2822 = vlog2.f32 %v1851_v3  ;;  %v1853_v33 = vpop.xlane.xlu0 %1852  ;;  %v1877_v7 = vmul.f32 0.6931472, %v2813_v27 }
 0x498   : > { %2824 = vlog2.f32 %v1853_v33 }
 0x499   : > { %v1898_v43 = vsub.f32 %v3595_v54, %v1877_v7 }
 0x49a   : > { %v2815_v10 = vpop.eup %2814  ;;  %v1855_v60 = vpop.xlane.xlu1 %1854 }
 0x49b   : > { %v2817_v1 = vpop.eup %2816  ;;  %v1879_v35 = vmul.f32 0.6931472, %v2815_v10  ;;  %2826 = vlog2.f32 %v1855_v60 }
 0x49c   : > { %v1873_v25 = vmul.f32 0.6931472, %v2817_v1 }
 0x49d   : > { %v1899_v55 = vsub.f32 %v3599_v57, %v1879_v35 }
 0x49e   : > { %v2819_v38 = vpop.eup %2818  ;;  %v1896_v13 = vsub.f32 %v3602_v8, %v1873_v25 }
 0x49f   : > { %v2270_v39 = vpack.c.bf16 %v1899_v55, %v1898_v43  ;;  %v1875_v42 = vmul.f32 0.6931472, %v2819_v38 }
 0x4a0   : > { %v2821_v15 = vpop.eup %2820 }
 0x4a1   : > { %2286 = vst [vmem:[%s3629_s9 + $0x28] sm:$0xff] %v2270_v39   ;;  %v1897_v47 = vsub.f32 %v3607_v22, %v1875_v42  ;;  %v1881_v52 = vmul.f32 0.6931472, %v2821_v15 }
 0x4a3   : > { %v2265_v41 = vpack.c.bf16 %v1897_v47, %v1896_v13  ;;  %v1900_v57 = vsub.f32 %v3611_v12, %v1881_v52 }
 0x4a4   : > { %v2823_v9 = vpop.eup %2822 }
 0x4a5   : > { %v2825_v56 = vpop.eup %2824  ;;  %2285 = vst [vmem:[%s3629_s9 + $0x20] sm:$0xff] %v2265_v41   ;;  %v1883_v54 = vmul.f32 0.6931472, %v2823_v9 }
 0x4a6   : > { %v1885_v48 = vmul.f32 0.6931472, %v2825_v56 }
 0x4a7   : > { %v1901_v37 = vsub.f32 %v3615_v18, %v1883_v54 }
 0x4a8   : > { %v2827_v40 = vpop.eup %2826  ;;  %v1902_v8 = vsub.f32 %v3618_v20, %v1885_v48 }
 0x4a9   : > { %v2275_v21 = vpack.c.bf16 %v1901_v37, %v1900_v57  ;;  %v1887_v36 = vmul.f32 0.6931472, %v2827_v40 }
 0x4ab   : > { %2287 = vst [vmem:[%s3629_s9 + $0x30] sm:$0xff] %v2275_v21   ;;  %v1903_v22 = vsub.f32 %v3623_v23, %v1887_v36  ;;  %1991 = sbr.rel (!%p3748_p1) target bundleno = 1227 (0x4cb), region = 68 }
 0x4ad   : > { %v2280_v29 = vpack.c.bf16 %v1903_v22, %v1902_v8 }
 0x4af   : > { %2288 = vst [vmem:[%s3629_s9 + $0x38] sm:$0xff] %v2280_v29  }
 0x4b0   : > { %s3757_s20 = smov (!%p1994_p6, %s1993_s20), 16 }
 0x4b1   : > { %s3657_s22 = sshll.u32 %s3757_s20, 6 }
 0x4b2   : > { %s1998_s17 = ssub.s32 1024, %s3657_s22 }
 0x4b3   : > { %1999 = vsyncadd %s1985_s19, %s1998_s17  ;;  %p2219_p11 = scmp.ne.s32.totalorder %s3657_s22, 0  ;;  %s2241_s13 = sshll.u32 %s3078_s28, 10 }
 0x4b4   : > { %s3667_s15 = scalar_lea.hbm %s3722_s7, %s2241_s13  ;;  %s2004_s18 = sshll.u32 %s3629_s9, 4  ;;  %s3670_s18 = int_to_ptr.vmem [resolvable:$true] %s2004_s18 }
 0x4b5   : > { %s2932_s23 = scalar_lea.vmem %s3670_s18, %s3657_s22  ;;  %s3014_s29 = smov [#allocation10]  }
 0x4b6   : > { %p2933_p3 = scmp.ne.s32.totalorder %s3670_s18, %s2932_s23  ;;  %s2936_s16 = sshll.u32 %s3014_s29, 4  ;;  %s2937_s16 = int_to_ptr.vmem [resolvable:$false] %s2936_s16 }
 0x4b7   : > { %s2938_s28 = scalar_lea.vmem %s2937_s16, 2048  ;;  %p2939_p9 = scmp.lt.s32.totalorder %s3670_s18, %s2937_s16 }
 0x4b8   : > { %p2934_p0 = pnand %p2933_p3, %p2219_p11  ;;  %p2940_p8 = scmp.lt.s32.totalorder %s2938_s28, %s2932_s23 }
 0x4ba   : > { %p2935_p2 = pneg %p2934_p0  ;;  %p2941_p12 = por %p2940_p8, %p2939_p9 }
 0x4bc   : > { %p2942_p5 = pnand %p2941_p12, %p2935_p2 }
 0x4be   : > { %2945 = shalt.err (!%p2942_p5)
}
 0x4bf   : > { %s2946_s8 = scalar_lea.hbm %s3667_s15, %s3657_s22  ;;  %s2950_s20 = scalar_lea.hbm %s3722_s7, 1600 }
 0x4c0   : > { %p2947_p13 = scmp.ne.s32.totalorder %s3667_s15, %s2946_s8  ;;  %p2951_p1 = scmp.lt.s32.totalorder %s3667_s15, %s3722_s7 }
 0x4c1   : > { %p2952_p6 = scmp.lt.s32.totalorder %s2950_s20, %s2946_s8 }
 0x4c2   : > { %p2948_p4 = pnand %p2947_p13, %p2219_p11 }
 0x4c3   : > { %p2953_p3 = por %p2952_p6, %p2951_p1 }
 0x4c4   : > { %p2949_p10 = pneg %p2948_p4 }
 0x4c6   : > { %p2954_p0 = pnand %p2953_p3, %p2949_p10 }
 0x4c8   : > { %2957 = shalt.err (!%p2954_p0)
}
 0x4c9   : > { %s3015_s11 = smov 64   ;;  %s3016_s12 = smov 4  }
 0x4ca   : > { %2010 = dma.vmem_to_hbm [thread:$0]  (%p2219_p11), %s3670_s18, %s3657_s22, %s3667_s15, %s1985_s19, %s3015_s11, %s3015_s11, %s3016_s12  }
 0x4cb PF: > { %s2019_s23 = sand.u32 1, %s2992_s24   ;;  %p3749_p2 = scmp.ne.s32.totalorder %s3729_s14, 0 }
 0x4cc   : > { %s2020_s29 = scalar_lea.sflag [#allocation4], %s2019_s23 }
 0x4cd   : > { %p2648_p9 = pnand %p2111_p7, %p3749_p2 }
 0x4cf   : > { %p2649_p8 = pneg %p2648_p9 }
 0x4d1   : > { %2987 = dma.done.wait (%p2649_p8), %s2020_s29, 1024  }
 0x4d2   : > { %2989 = vsyncadd (%p2649_p8), %s2020_s29, 4294966272  ;;  %p22_p12 = scmp.ge.s32.totalorder %s3082_s30, 4   ;;  %s3750_s24 = smov %s2996_s25 }
 0x4d3   : > { %s3751_s25 = smov %s3000_s26  ;;  %s3752_s26 = smov %s3094_s10 }
 0x4d4   : > { %s3753_s27 = smov %s3082_s30  ;;  %24 = sbr.rel (!%p22_p12) target bundleno = 9 (0x9), region = 105 }
 0x4d9   :  { %2025 = vsyncpa [#allocation3], 1 }
 0x4da   :  { %2027 = vsyncpa [#allocation3 + $0x1], 1 }
 0x4db   :  { %2028 = vsyncpa [#allocation6], 1 }
 0x4dc   :  { %2029 = vsyncpa [#allocation9], 1 }
 0x4dd   :  { %2030 = vsyncpa [#allocation4], 1 }
 0x4de   :  { %2032 = vsyncpa [#allocation4 + $0x1], 1 }

</bundles_post_ra>
